<compile_context>
chip_gen: v6e
topology: v6e:2x2x1
jax: 0.10.0
libtpu: 0.0.40
codegen_flags: <defaults>
</compile_context>

<pallas_src>
import functools
import math

import jax
import jax.numpy as jnp
from jax.experimental import pallas as pl
from jax.experimental.pallas import tpu as pltpu


def _vmem_limit_bytes(tile_bytes):
    """Double-buffered tile footprint + headroom; floor 32 MiB, cap 96 MiB."""
    need = 2 * int(tile_bytes) + (4 << 20)
    return int(min(max(need, 32 << 20), 96 << 20))


# ----------------------------------------------------------------------------
# GRU recurrence kernel. Grid: (branch, time_chunk).
# Per grid step: T_CHUNK recurrence steps; one fused (B,H)@(H,3H) MXU matmul
# per step (bf16 inputs, f32 accumulation).
# ----------------------------------------------------------------------------
def _gru_kernel(gi_ref, whh_ref, bhhn_ref, len_ref, out_ref, hn_ref, h_ref,
                *, t_chunk, hidden):
    c = pl.program_id(1)                       # time-chunk index

    @pl.when(c == 0)
    def _():                                   # re-init hidden at branch start
        h_ref[...] = jnp.zeros_like(h_ref)

    whh3 = whh_ref[0]                          # (H, 3H) bf16, pre-transposed+fused
    bhh_n = bhhn_ref[0]                        # (1, H) f32
    rem = len_ref[0] - c * t_chunk             # (B, 1) int32, hoisted mask base

    def step(i, h):
        # single merged gate matmul on the serial critical path
        gh = jnp.dot(h.astype(whh3.dtype), whh3,
                     preferred_element_type=jnp.float32)          # (B, 3H)
        gi_r = gi_ref[0, 0, i]                                    # (B, H)
        gi_z = gi_ref[0, 1, i]
        gi_n = gi_ref[0, 2, i]
        r = jax.nn.sigmoid(gi_r + gh[:, :hidden])
        z = jax.nn.sigmoid(gi_z + gh[:, hidden:2 * hidden])
        n = jnp.tanh(gi_n + r * (gh[:, 2 * hidden:] + bhh_n))
        h_new = (1.0 - z) * n + z * h
        valid = rem > i                        # (B, 1): freeze state past length
        h = jnp.where(valid, h_new, h)
        out_ref[0, i] = jnp.where(valid, h, 0.0).astype(out_ref.dtype)
        return h

    h = jax.lax.fori_loop(0, t_chunk, step, h_ref[...], unroll=True)
    h_ref[...] = h
    hn_ref[0] = h                              # final value == h at length-1


def gru_forward_stacked(x, length, p, *, t_chunk=16):
    """x: (N,B,T,D) f32, length: (N,B) int. Returns out_tm (N,T,B,H) bf16, hn (N,B,H) f32."""
    N, B, T, D = x.shape
    H = p["w_hh"].shape[1] // 3

    # ---- hoisted input projection: one big batched matmul in plain JAX ----
    gi = jnp.einsum("nbtd,ngd->nbtg", x, p["w_ih"]) + p["b_ih"][:, None, None, :]
    gi = gi.reshape(N, B, T, 3, H)
    # fold b_hh into the r/z gates (linear inside sigmoid); keep b_hh_n separate
    bhh3 = p["b_hh"].reshape(N, 3, H)
    gi = gi + (bhh3 * jnp.array([1.0, 1.0, 0.0], jnp.float32)[None, :, None])[:, None, None]
    gi_t = jnp.transpose(gi, (0, 3, 2, 1, 4))          # (N, 3, T, B, H) time-major

    tc = max(1, min(t_chunk, T))
    T_pad = pl.cdiv(T, tc) * tc
    if T_pad != T:                                      # padded steps are masked out
        gi_t = jnp.pad(gi_t, ((0, 0), (0, 0), (0, T_pad - T), (0, 0), (0, 0)))

    # merged + pre-transposed recurrence weights: (N, H, 3H), bf16 for the MXU
    whh3 = jnp.transpose(p["w_hh"].reshape(N, 3, H, H),
                         (0, 3, 1, 2)).reshape(N, H, 3 * H).astype(jnp.bfloat16)
    bhh_n = p["b_hh"][:, 2 * H:].reshape(N, 1, H)
    len3 = length.reshape(N, B, 1).astype(jnp.int32)

    tile_bytes = (3 * tc * B * H * 4 + H * 3 * H * 2 + H * 4 + B * 4
                  + tc * B * H * 2 + 2 * B * H * 4)

    kernel = functools.partial(_gru_kernel, t_chunk=tc, hidden=H)
    out_t, hn = pl.pallas_call(
        kernel,
        out_shape=(jax.ShapeDtypeStruct((N, T_pad, B, H), jnp.bfloat16),
                   jax.ShapeDtypeStruct((N, B, H), jnp.float32)),
        grid_spec=pltpu.PrefetchScalarGridSpec(
            num_scalar_prefetch=0,
            grid=(N, T_pad // tc),
            in_specs=[
                pl.BlockSpec((1, 3, tc, B, H), lambda n, c: (n, 0, c, 0, 0)),
                pl.BlockSpec((1, H, 3 * H), lambda n, c: (n, 0, 0)),
                pl.BlockSpec((1, 1, H), lambda n, c: (n, 0, 0)),
                pl.BlockSpec((1, B, 1), lambda n, c: (n, 0, 0)),
            ],
            out_specs=(pl.BlockSpec((1, tc, B, H), lambda n, c: (n, c, 0, 0)),
                       pl.BlockSpec((1, B, H), lambda n, c: (n, 0, 0))),
            scratch_shapes=[pltpu.VMEM((B, H), jnp.float32)],
        ),
        compiler_params=pltpu.CompilerParams(
            dimension_semantics=("parallel", "arbitrary"),
            vmem_limit_bytes=_vmem_limit_bytes(tile_bytes)),
    )(gi_t, whh3, bhh_n, len3)
    return out_t[:, :T], hn


# ----------------------------------------------------------------------------
# TimeAttn kernel. Grid: (branch, batch_chunk). Consumes time-major GRU output
# (bf16), a hoisted per-batch query projection qk (bf16) and a dense (T, Bc)
# score bias — no lane-sparse (T,Bc,1) tiles anywhere.
# ----------------------------------------------------------------------------
def _attn_kernel(out_ref, qk_ref, bias_ref, o_ref):
    out = out_ref[0].astype(jnp.float32)               # (T, Bc, H)
    qk = qk_ref[0].astype(jnp.float32)                 # (Bc, H)
    s = jnp.sum(out * qk[None, :, :], axis=-1) + bias_ref[0]     # (T, Bc) scores
    m = jnp.max(s, axis=0, keepdims=True)              # (1, Bc)
    e = jnp.exp(s - m)
    denom = jnp.sum(e, axis=0, keepdims=True)
    p = e / denom                                      # exact softmax (no approx recip)
    o_ref[0] = jnp.sum(p[:, :, None] * out, axis=0)    # (Bc, H) weighted sum


def time_attn_forward_stacked(out_tm, hn, pos_ind, rel_dt, p, beta, *, b_chunk=None):
    """out_tm: (N,T,B,H) bf16, hn: (N,B,H) f32, pos_ind/rel_dt: (N,B,T). Returns (N,B,H) f32."""
    N, T, B, H = out_tm.shape
    time_dim = p["pos_emb"].shape[-1]
    temperature = math.sqrt(float(H))

    # score tables: rel_emb @ w_rel, pos_emb @ w_pos (150-vector each), gathered
    # in plain JAX -> only a dense (T,B) bias enters the kernel.
    rel_tbl = jnp.einsum("nvd,nd->nv", p["rel_emb"], p["w_rp"][:, 0, :time_dim])
    pos_tbl = jnp.einsum("nvd,nd->nv", p["pos_emb"], p["w_rp"][:, 0, time_dim:])
    attn1 = (jnp.take_along_axis(rel_tbl, rel_dt.reshape(N, -1), axis=1)
             + jnp.take_along_axis(pos_tbl, pos_ind.reshape(N, -1), axis=1)).reshape(N, B, T)
    bias = jnp.where(pos_ind == 0, -jnp.inf, beta * attn1)          # (N, B, T)
    bias_tb = jnp.transpose(bias, (0, 2, 1))                        # (N, T, B)

    # hoisted query projection: qk = hn @ (W_q^T W_k) / temperature, once per branch
    wqk = jnp.einsum("nij,nik->njk", p["w_q"], p["w_k"]) / temperature
    qk = jnp.einsum("nbh,nhk->nbk", hn, wqk).astype(jnp.bfloat16)   # (N, B, H)

    # b_chunk must divide B (and keep (8,128) tiling if < B); otherwise use full B
    # rather than silently dropping tail batches.
    if b_chunk is None or b_chunk >= B or B % b_chunk != 0 or b_chunk % 8 != 0:
        b_chunk = B
    nb = B // b_chunk

    tile_bytes = (T * b_chunk * H * 2 + b_chunk * H * 2
                  + T * b_chunk * 4 + b_chunk * H * 4)

    o = pl.pallas_call(
        _attn_kernel,
        out_shape=jax.ShapeDtypeStruct((N, B, H), jnp.float32),
        grid_spec=pltpu.PrefetchScalarGridSpec(
            num_scalar_prefetch=0,
            grid=(N, nb),
            in_specs=[
                pl.BlockSpec((1, T, b_chunk, H), lambda n, b: (n, 0, b, 0)),
                pl.BlockSpec((1, b_chunk, H), lambda n, b: (n, b, 0)),
                pl.BlockSpec((1, T, b_chunk), lambda n, b: (n, 0, b)),
            ],
            out_specs=pl.BlockSpec((1, b_chunk, H), lambda n, b: (n, b, 0)),
        ),
        compiler_params=pltpu.CompilerParams(
            dimension_semantics=("parallel", "parallel"),
            vmem_limit_bytes=_vmem_limit_bytes(tile_bytes)),
    )(out_tm, qk, bias_tb)
    return o


# ----------------------------------------------------------------------------
# Module wrappers + deterministic parameter init
# ----------------------------------------------------------------------------
def init_gru_module_params(key, input_dim, gru_dim, time_dim):
    ks = jax.random.split(key, 9)
    kg = 1.0 / math.sqrt(gru_dim)            # PyTorch GRU default init range
    u = lambda k, shape, a: jax.random.uniform(k, shape, jnp.float32, -a, a)
    return {
        "gru": {
            "w_ih": u(ks[0], (3 * gru_dim, input_dim), kg),
            "w_hh": u(ks[1], (3 * gru_dim, gru_dim), kg),
            "b_ih": u(ks[2], (3 * gru_dim,), kg),
            "b_hh": u(ks[3], (3 * gru_dim,), kg),
        },
        "attn": {
            "pos_emb": u(ks[4], (150, time_dim), 0.1),
            "rel_emb": u(ks[5], (150, time_dim), 0.1),
            "w_k": u(ks[6], (gru_dim, gru_dim), 0.1),
            "w_q": u(ks[7], (gru_dim, gru_dim), 0.1),
            "w_rp": u(ks[8], (1, 2 * time_dim), 0.1),
        },
    }


def init_squential_params(key, input_size, gru_size, time_dim):
    ku, ki = jax.random.split(key)
    return {"u_gru": init_gru_module_params(ku, input_size, gru_size, time_dim),
            "i_gru": init_gru_module_params(ki, input_size, gru_size, time_dim)}


def squential_forward(params, reviews_u, reviews_i, u_len, i_len,
                      u_pos, u_rel, i_pos, i_rel, beta, *, t_chunk=16):
    # Stack the two independent branches on a leading axis so a single
    # pallas_call handles both; the branch axis is 'parallel' (megacore on v7x).
    stacked = jax.tree_util.tree_map(lambda a, b: jnp.stack([a, b]),
                                     params["u_gru"], params["i_gru"])
    x = jnp.stack([reviews_u, reviews_i])              # (2, B, T, D)
    length = jnp.stack([u_len, i_len])                 # (2, B)
    pos = jnp.stack([u_pos, i_pos])                    # (2, B, T)
    rel = jnp.stack([u_rel, i_rel])                    # (2, B, T)

    out_tm, hn = gru_forward_stacked(x, length, stacked["gru"], t_chunk=t_chunk)
    o = time_attn_forward_stacked(out_tm, hn, pos, rel, stacked["attn"], beta)
    return o[0], o[1]


# ----------------------------------------------------------------------------
# Pure-JAX f32 reference (for self-check)
# ----------------------------------------------------------------------------
def _ref_gru(x, length, p):
    B, T, D = x.shape
    H = p["w_hh"].shape[0] // 3

    def cell(h, xt_t):
        xt, t = xt_t
        gi = xt @ p["w_ih"].T + p["b_ih"]
        gh = h @ p["w_hh"].T + p["b_hh"]
        r = jax.nn.sigmoid(gi[:, :H] + gh[:, :H])
        z = jax.nn.sigmoid(gi[:, H:2 * H] + gh[:, H:2 * H])
        n = jnp.tanh(gi[:, 2 * H:] + r * gh[:, 2 * H:])
        h_new = (1.0 - z) * n + z * h
        valid = (length > t)[:, None]
        h_upd = jnp.where(valid, h_new, h)
        return h_upd, jnp.where(valid, h_upd, 0.0)

    h0 = jnp.zeros((B, H), jnp.float32)
    hn, outs = jax.lax.scan(cell, h0, (jnp.transpose(x, (1, 0, 2)), jnp.arange(T)))
    return jnp.transpose(outs, (1, 0, 2)), hn


def _ref_module(params, x, length, pos_ind, rel_dt, beta):
    out, hn = _ref_gru(x, length, params["gru"])
    p = params["attn"]
    H = out.shape[-1]
    pos_e = jnp.take(p["pos_emb"], pos_ind, axis=0)
    rel_e = jnp.take(p["rel_emb"], rel_dt, axis=0)
    k = out @ p["w_k"].T
    q = hn @ p["w_q"].T
    a0 = jnp.einsum("bth,bh->bt", k, q) / math.sqrt(float(H))
    a1 = (jnp.concatenate([rel_e, pos_e], -1) @ p["w_rp"].T)[..., 0]
    a = a0 + beta * a1
    a = jnp.where(pos_ind == 0, -jnp.inf, a)
    a = jax.nn.softmax(a, axis=1)
    return jnp.einsum("bt,bth->bh", a, out)


if __name__ == "__main__":
    B, T = 2, 8
    input_size, gru_size, time_dim = 16, 32, 8
    beta = 0.5

    root = jax.random.PRNGKey(0)
    kp, kx1, kx2, kr1, kr2 = jax.random.split(root, 5)
    params = init_squential_params(kp, input_size, gru_size, time_dim)

    reviews_u = jax.random.normal(kx1, (B, T, input_size), jnp.float32)
    reviews_i = jax.random.normal(kx2, (B, T, input_size), jnp.float32)
    u_len = jnp.array([T, 5], jnp.int32)
    i_len = jnp.array([6, T], jnp.int32)

    t_idx = jnp.arange(T, dtype=jnp.int32)[None, :]
    u_pos = jnp.where(t_idx < u_len[:, None], t_idx + 1, 0)      # 0 marks padding
    i_pos = jnp.where(t_idx < i_len[:, None], t_idx + 1, 0)
    u_rel = jax.random.randint(kr1, (B, T), 1, 150, jnp.int32)
    i_rel = jax.random.randint(kr2, (B, T), 1, 150, jnp.int32)

    u_hn, i_hn = squential_forward(params, reviews_u, reviews_i,
                                   u_len, i_len, u_pos, u_rel, i_pos, i_rel, beta)
    jax.block_until_ready((u_hn, i_hn))

    # self-check against pure-JAX f32 reference (kernel uses bf16 MXU inputs /
    # bf16 out_tm stream, hence the relaxed 2e-2 tolerance)
    u_ref = _ref_module(params["u_gru"], reviews_u, u_len, u_pos, u_rel, beta)
    i_ref = _ref_module(params["i_gru"], reviews_i, i_len, i_pos, i_rel, beta)
    assert u_hn.shape == (B, gru_size) and i_hn.shape == (B, gru_size)
    assert jnp.allclose(u_hn, u_ref, rtol=2e-2, atol=2e-2), \
        float(jnp.max(jnp.abs(u_hn - u_ref)))
    assert jnp.allclose(i_hn, i_ref, rtol=2e-2, atol=2e-2), \
        float(jnp.max(jnp.abs(i_hn - i_ref)))

    print("KERNEL_OK")
</pallas_src>

<mosaic_0001>
module attributes {stable_mosaic.version = 11 : i64} {
  func.func @_gru_kernel(%arg0: i32, %arg1: i32, %arg2: memref<1x3x8x2x32xf32, #tpu.memory_space<vmem>>, %arg3: memref<1x32x96xbf16, #tpu.memory_space<vmem>>, %arg4: memref<1x1x32xf32, #tpu.memory_space<vmem>>, %arg5: memref<1x2x1xi32, #tpu.memory_space<vmem>>, %arg6: memref<1x8x2x32xbf16, #tpu.memory_space<vmem>>, %arg7: memref<1x2x32xf32, #tpu.memory_space<vmem>>, %arg8: memref<2x32xf32, #tpu.memory_space<vmem>>) attributes {dimension_semantics = [#tpu.dimension_semantics<parallel>, #tpu.dimension_semantics<arbitrary>], iteration_bounds = array<i64: 2, 1>, scalar_prefetch = 0 : i64, scratch_operands = 1 : i64, tpu.core_type = #tpu.core_type<tc>, window_params = [{transform_indices = @transform_0, window_bounds = array<i64: 1, 3, 8, 2, 32>}, {transform_indices = @transform_1, window_bounds = array<i64: 1, 32, 96>}, {transform_indices = @transform_2, window_bounds = array<i64: 1, 1, 32>}, {transform_indices = @transform_3, window_bounds = array<i64: 1, 2, 1>}, {transform_indices = @transform_4, window_bounds = array<i64: 1, 8, 2, 32>}, {transform_indices = @transform_5, window_bounds = array<i64: 1, 2, 32>}]} {
    %c0_i32 = arith.constant 0 : i32
    %0 = arith.cmpi eq, %arg1, %c0_i32 : i32
    %1 = arith.extui %0 : i1 to i32
    %c0_i32_0 = arith.constant 0 : i32
    %2 = arith.cmpi ne, %1, %c0_i32_0 : i32
    scf.if %2 {
      %cst_175 = arith.constant 0.000000e+00 : f32
      %417 = vector.broadcast %cst_175 : f32 to vector<2x32xf32>
      %c0_176 = arith.constant 0 : index
      %c0_177 = arith.constant 0 : index
      %418 = vector.load %arg8[%c0_176, %c0_177] : memref<2x32xf32, #tpu.memory_space<vmem>>, vector<2x32xf32>
      tpu.vector_store %arg8[%c0_176, %c0_177], %417 {strides = array<i32>} : memref<2x32xf32, #tpu.memory_space<vmem>>, vector<2x32xf32>,
    } else {
    }
    %c0 = arith.constant 0 : index
    %c0_1 = arith.constant 0 : index
    %c0_2 = arith.constant 0 : index
    %3 = vector.load %arg3[%c0, %c0_1, %c0_2] : memref<1x32x96xbf16, #tpu.memory_space<vmem>>, vector<1x32x96xbf16>
    %4 = vector.shape_cast %3 : vector<1x32x96xbf16> to vector<32x96xbf16>
    %c0_3 = arith.constant 0 : index
    %c0_4 = arith.constant 0 : index
    %c0_5 = arith.constant 0 : index
    %5 = vector.load %arg4[%c0_3, %c0_4, %c0_5] : memref<1x1x32xf32, #tpu.memory_space<vmem>>, vector<1x1x32xf32>
    %6 = vector.shape_cast %5 : vector<1x1x32xf32> to vector<1x32xf32>
    %c0_6 = arith.constant 0 : index
    %c0_7 = arith.constant 0 : index
    %c0_8 = arith.constant 0 : index
    %7 = vector.load %arg5[%c0_6, %c0_7, %c0_8] : memref<1x2x1xi32, #tpu.memory_space<vmem>>, vector<1x2x1xi32>
    %8 = vector.shape_cast %7 : vector<1x2x1xi32> to vector<2x1xi32>
    %c8_i32 = arith.constant 8 : i32
    %9 = arith.muli %arg1, %c8_i32 : i32
    %10 = vector.broadcast %9 : i32 to vector<2x1xi32>
    %11 = arith.subi %8, %10 : vector<2x1xi32>
    %c0_9 = arith.constant 0 : index
    %c0_10 = arith.constant 0 : index
    %12 = vector.load %arg8[%c0_9, %c0_10] : memref<2x32xf32, #tpu.memory_space<vmem>>, vector<2x32xf32>
    %c0_i32_11 = arith.constant 0 : i32
    %13 = arith.truncf %12 : vector<2x32xf32> to vector<2x32xbf16>
    %cst = arith.constant dense<0.000000e+00> : vector<2x96xf32>
    %14 = tpu.matmul %13, %4, %cst {dimension_numbers = #tpu.dot_dimension_numbers<[1], [0], [0], [1], [0, 0, 1, 1], [], []>} : vector<2x32xbf16>, vector<32x96xbf16>, vector<2x96xf32> -> vector<2x96xf32>
    %c0_12 = arith.constant 0 : index
    %c0_13 = arith.constant 0 : index
    %15 = arith.index_cast %c0_i32_11 : i32 to index
    %c0_14 = arith.constant 0 : index
    %c0_15 = arith.constant 0 : index
    %16 = vector.load %arg2[%c0_12, %c0_13, %15, %c0_14, %c0_15] : memref<1x3x8x2x32xf32, #tpu.memory_space<vmem>>, vector<1x1x1x2x32xf32>
    %17 = vector.shape_cast %16 : vector<1x1x1x2x32xf32> to vector<2x32xf32>
    %c0_16 = arith.constant 0 : index
    %c1 = arith.constant 1 : index
    %18 = arith.index_cast %c0_i32_11 : i32 to index
    %c0_17 = arith.constant 0 : index
    %c0_18 = arith.constant 0 : index
    %19 = vector.load %arg2[%c0_16, %c1, %18, %c0_17, %c0_18] : memref<1x3x8x2x32xf32, #tpu.memory_space<vmem>>, vector<1x1x1x2x32xf32>
    %20 = vector.shape_cast %19 : vector<1x1x1x2x32xf32> to vector<2x32xf32>
    %c0_19 = arith.constant 0 : index
    %c2 = arith.constant 2 : index
    %21 = arith.index_cast %c0_i32_11 : i32 to index
    %c0_20 = arith.constant 0 : index
    %c0_21 = arith.constant 0 : index
    %22 = vector.load %arg2[%c0_19, %c2, %21, %c0_20, %c0_21] : memref<1x3x8x2x32xf32, #tpu.memory_space<vmem>>, vector<1x1x1x2x32xf32>
    %23 = vector.shape_cast %22 : vector<1x1x1x2x32xf32> to vector<2x32xf32>
    %24 = vector.extract_strided_slice %14 {offsets = [0, 0], sizes = [2, 32], strides = [1, 1]} : vector<2x96xf32> to vector<2x32xf32>
    %25 = arith.addf %17, %24 : vector<2x32xf32>
    %26 = arith.negf %25 : vector<2x32xf32>
    %27 = math.exp %26 : vector<2x32xf32>
    %cst_22 = arith.constant 1.000000e+00 : f32
    %28 = vector.broadcast %cst_22 : f32 to vector<2x32xf32>
    %29 = arith.addf %28, %27 : vector<2x32xf32>
    %30 = arith.divf %28, %29 : vector<2x32xf32>
    %31 = vector.extract_strided_slice %14 {offsets = [0, 32], sizes = [2, 32], strides = [1, 1]} : vector<2x96xf32> to vector<2x32xf32>
    %32 = arith.addf %20, %31 : vector<2x32xf32>
    %33 = arith.negf %32 : vector<2x32xf32>
    %34 = math.exp %33 : vector<2x32xf32>
    %cst_23 = arith.constant 1.000000e+00 : f32
    %35 = vector.broadcast %cst_23 : f32 to vector<2x32xf32>
    %36 = arith.addf %35, %34 : vector<2x32xf32>
    %37 = arith.divf %35, %36 : vector<2x32xf32>
    %38 = vector.extract_strided_slice %14 {offsets = [0, 64], sizes = [2, 32], strides = [1, 1]} : vector<2x96xf32> to vector<2x32xf32>
    %39 = vector.broadcast %6 : vector<1x32xf32> to vector<2x32xf32>
    %40 = arith.addf %38, %39 : vector<2x32xf32>
    %41 = arith.mulf %30, %40 : vector<2x32xf32>
    %42 = arith.addf %23, %41 : vector<2x32xf32>
    %43 = math.tanh %42 : vector<2x32xf32>
    %cst_24 = arith.constant 1.000000e+00 : f32
    %44 = vector.broadcast %cst_24 : f32 to vector<2x32xf32>
    %45 = arith.subf %44, %37 : vector<2x32xf32>
    %46 = arith.mulf %45, %43 : vector<2x32xf32>
    %47 = arith.mulf %37, %12 : vector<2x32xf32>
    %48 = arith.addf %46, %47 : vector<2x32xf32>
    %49 = vector.broadcast %c0_i32_11 : i32 to vector<2x1xi32>
    %50 = arith.cmpi sgt, %11, %49 : vector<2x1xi32>
    %51 = vector.shape_cast %50 : vector<2x1xi1> to vector<2x1xi1>
    %52 = vector.broadcast %51 : vector<2x1xi1> to vector<2x32xi1>
    %53 = arith.select %52, %48, %12 : vector<2x32xi1>, vector<2x32xf32>
    %cst_25 = arith.constant 0.000000e+00 : f32
    %54 = vector.shape_cast %50 : vector<2x1xi1> to vector<2x1xi1>
    %55 = vector.broadcast %54 : vector<2x1xi1> to vector<2x32xi1>
    %56 = vector.broadcast %cst_25 : f32 to vector<2x32xf32>
    %57 = arith.select %55, %53, %56 : vector<2x32xi1>, vector<2x32xf32>
    %58 = arith.truncf %57 : vector<2x32xf32> to vector<2x32xbf16>
    %c0_26 = arith.constant 0 : index
    %59 = arith.index_cast %c0_i32_11 : i32 to index
    %c0_27 = arith.constant 0 : index
    %c0_28 = arith.constant 0 : index
    %60 = vector.load %arg6[%c0_26, %59, %c0_27, %c0_28] : memref<1x8x2x32xbf16, #tpu.memory_space<vmem>>, vector<1x1x2x32xbf16>
    %61 = vector.shape_cast %60 : vector<1x1x2x32xbf16> to vector<2x32xbf16>
    %62 = vector.shape_cast %58 : vector<2x32xbf16> to vector<1x1x2x32xbf16>
    tpu.vector_store %arg6[%c0_26, %59, %c0_27, %c0_28], %62 {strides = array<i32>} : memref<1x8x2x32xbf16, #tpu.memory_space<vmem>>, vector<1x1x2x32xbf16>,
    %c1_i32 = arith.constant 1 : i32
    %63 = arith.truncf %53 : vector<2x32xf32> to vector<2x32xbf16>
    %cst_29 = arith.constant dense<0.000000e+00> : vector<2x96xf32>
    %64 = tpu.matmul %63, %4, %cst_29 {dimension_numbers = #tpu.dot_dimension_numbers<[1], [0], [0], [1], [0, 0, 1, 1], [], []>} : vector<2x32xbf16>, vector<32x96xbf16>, vector<2x96xf32> -> vector<2x96xf32>
    %c0_30 = arith.constant 0 : index
    %c0_31 = arith.constant 0 : index
    %65 = arith.index_cast %c1_i32 : i32 to index
    %c0_32 = arith.constant 0 : index
    %c0_33 = arith.constant 0 : index
    %66 = vector.load %arg2[%c0_30, %c0_31, %65, %c0_32, %c0_33] : memref<1x3x8x2x32xf32, #tpu.memory_space<vmem>>, vector<1x1x1x2x32xf32>
    %67 = vector.shape_cast %66 : vector<1x1x1x2x32xf32> to vector<2x32xf32>
    %c0_34 = arith.constant 0 : index
    %c1_35 = arith.constant 1 : index
    %68 = arith.index_cast %c1_i32 : i32 to index
    %c0_36 = arith.constant 0 : index
    %c0_37 = arith.constant 0 : index
    %69 = vector.load %arg2[%c0_34, %c1_35, %68, %c0_36, %c0_37] : memref<1x3x8x2x32xf32, #tpu.memory_space<vmem>>, vector<1x1x1x2x32xf32>
    %70 = vector.shape_cast %69 : vector<1x1x1x2x32xf32> to vector<2x32xf32>
    %c0_38 = arith.constant 0 : index
    %c2_39 = arith.constant 2 : index
    %71 = arith.index_cast %c1_i32 : i32 to index
    %c0_40 = arith.constant 0 : index
    %c0_41 = arith.constant 0 : index
    %72 = vector.load %arg2[%c0_38, %c2_39, %71, %c0_40, %c0_41] : memref<1x3x8x2x32xf32, #tpu.memory_space<vmem>>, vector<1x1x1x2x32xf32>
    %73 = vector.shape_cast %72 : vector<1x1x1x2x32xf32> to vector<2x32xf32>
    %74 = vector.extract_strided_slice %64 {offsets = [0, 0], sizes = [2, 32], strides = [1, 1]} : vector<2x96xf32> to vector<2x32xf32>
    %75 = arith.addf %67, %74 : vector<2x32xf32>
    %76 = arith.negf %75 : vector<2x32xf32>
    %77 = math.exp %76 : vector<2x32xf32>
    %cst_42 = arith.constant 1.000000e+00 : f32
    %78 = vector.broadcast %cst_42 : f32 to vector<2x32xf32>
    %79 = arith.addf %78, %77 : vector<2x32xf32>
    %80 = arith.divf %78, %79 : vector<2x32xf32>
    %81 = vector.extract_strided_slice %64 {offsets = [0, 32], sizes = [2, 32], strides = [1, 1]} : vector<2x96xf32> to vector<2x32xf32>
    %82 = arith.addf %70, %81 : vector<2x32xf32>
    %83 = arith.negf %82 : vector<2x32xf32>
    %84 = math.exp %83 : vector<2x32xf32>
    %cst_43 = arith.constant 1.000000e+00 : f32
    %85 = vector.broadcast %cst_43 : f32 to vector<2x32xf32>
    %86 = arith.addf %85, %84 : vector<2x32xf32>
    %87 = arith.divf %85, %86 : vector<2x32xf32>
    %88 = vector.extract_strided_slice %64 {offsets = [0, 64], sizes = [2, 32], strides = [1, 1]} : vector<2x96xf32> to vector<2x32xf32>
    %89 = vector.broadcast %6 : vector<1x32xf32> to vector<2x32xf32>
    %90 = arith.addf %88, %89 : vector<2x32xf32>
    %91 = arith.mulf %80, %90 : vector<2x32xf32>
    %92 = arith.addf %73, %91 : vector<2x32xf32>
    %93 = math.tanh %92 : vector<2x32xf32>
    %cst_44 = arith.constant 1.000000e+00 : f32
    %94 = vector.broadcast %cst_44 : f32 to vector<2x32xf32>
    %95 = arith.subf %94, %87 : vector<2x32xf32>
    %96 = arith.mulf %95, %93 : vector<2x32xf32>
    %97 = arith.mulf %87, %53 : vector<2x32xf32>
    %98 = arith.addf %96, %97 : vector<2x32xf32>
    %99 = vector.broadcast %c1_i32 : i32 to vector<2x1xi32>
    %100 = arith.cmpi sgt, %11, %99 : vector<2x1xi32>
    %101 = vector.shape_cast %100 : vector<2x1xi1> to vector<2x1xi1>
    %102 = vector.broadcast %101 : vector<2x1xi1> to vector<2x32xi1>
    %103 = arith.select %102, %98, %53 : vector<2x32xi1>, vector<2x32xf32>
    %cst_45 = arith.constant 0.000000e+00 : f32
    %104 = vector.shape_cast %100 : vector<2x1xi1> to vector<2x1xi1>
    %105 = vector.broadcast %104 : vector<2x1xi1> to vector<2x32xi1>
    %106 = vector.broadcast %cst_45 : f32 to vector<2x32xf32>
    %107 = arith.select %105, %103, %106 : vector<2x32xi1>, vector<2x32xf32>
    %108 = arith.truncf %107 : vector<2x32xf32> to vector<2x32xbf16>
    %c0_46 = arith.constant 0 : index
    %109 = arith.index_cast %c1_i32 : i32 to index
    %c0_47 = arith.constant 0 : index
    %c0_48 = arith.constant 0 : index
    %110 = vector.load %arg6[%c0_46, %109, %c0_47, %c0_48] : memref<1x8x2x32xbf16, #tpu.memory_space<vmem>>, vector<1x1x2x32xbf16>
    %111 = vector.shape_cast %110 : vector<1x1x2x32xbf16> to vector<2x32xbf16>
    %112 = vector.shape_cast %108 : vector<2x32xbf16> to vector<1x1x2x32xbf16>
    tpu.vector_store %arg6[%c0_46, %109, %c0_47, %c0_48], %112 {strides = array<i32>} : memref<1x8x2x32xbf16, #tpu.memory_space<vmem>>, vector<1x1x2x32xbf16>,
    %c2_i32 = arith.constant 2 : i32
    %113 = arith.truncf %103 : vector<2x32xf32> to vector<2x32xbf16>
    %cst_49 = arith.constant dense<0.000000e+00> : vector<2x96xf32>
    %114 = tpu.matmul %113, %4, %cst_49 {dimension_numbers = #tpu.dot_dimension_numbers<[1], [0], [0], [1], [0, 0, 1, 1], [], []>} : vector<2x32xbf16>, vector<32x96xbf16>, vector<2x96xf32> -> vector<2x96xf32>
    %c0_50 = arith.constant 0 : index
    %c0_51 = arith.constant 0 : index
    %115 = arith.index_cast %c2_i32 : i32 to index
    %c0_52 = arith.constant 0 : index
    %c0_53 = arith.constant 0 : index
    %116 = vector.load %arg2[%c0_50, %c0_51, %115, %c0_52, %c0_53] : memref<1x3x8x2x32xf32, #tpu.memory_space<vmem>>, vector<1x1x1x2x32xf32>
    %117 = vector.shape_cast %116 : vector<1x1x1x2x32xf32> to vector<2x32xf32>
    %c0_54 = arith.constant 0 : index
    %c1_55 = arith.constant 1 : index
    %118 = arith.index_cast %c2_i32 : i32 to index
    %c0_56 = arith.constant 0 : index
    %c0_57 = arith.constant 0 : index
    %119 = vector.load %arg2[%c0_54, %c1_55, %118, %c0_56, %c0_57] : memref<1x3x8x2x32xf32, #tpu.memory_space<vmem>>, vector<1x1x1x2x32xf32>
    %120 = vector.shape_cast %119 : vector<1x1x1x2x32xf32> to vector<2x32xf32>
    %c0_58 = arith.constant 0 : index
    %c2_59 = arith.constant 2 : index
    %121 = arith.index_cast %c2_i32 : i32 to index
    %c0_60 = arith.constant 0 : index
    %c0_61 = arith.constant 0 : index
    %122 = vector.load %arg2[%c0_58, %c2_59, %121, %c0_60, %c0_61] : memref<1x3x8x2x32xf32, #tpu.memory_space<vmem>>, vector<1x1x1x2x32xf32>
    %123 = vector.shape_cast %122 : vector<1x1x1x2x32xf32> to vector<2x32xf32>
    %124 = vector.extract_strided_slice %114 {offsets = [0, 0], sizes = [2, 32], strides = [1, 1]} : vector<2x96xf32> to vector<2x32xf32>
    %125 = arith.addf %117, %124 : vector<2x32xf32>
    %126 = arith.negf %125 : vector<2x32xf32>
    %127 = math.exp %126 : vector<2x32xf32>
    %cst_62 = arith.constant 1.000000e+00 : f32
    %128 = vector.broadcast %cst_62 : f32 to vector<2x32xf32>
    %129 = arith.addf %128, %127 : vector<2x32xf32>
    %130 = arith.divf %128, %129 : vector<2x32xf32>
    %131 = vector.extract_strided_slice %114 {offsets = [0, 32], sizes = [2, 32], strides = [1, 1]} : vector<2x96xf32> to vector<2x32xf32>
    %132 = arith.addf %120, %131 : vector<2x32xf32>
    %133 = arith.negf %132 : vector<2x32xf32>
    %134 = math.exp %133 : vector<2x32xf32>
    %cst_63 = arith.constant 1.000000e+00 : f32
    %135 = vector.broadcast %cst_63 : f32 to vector<2x32xf32>
    %136 = arith.addf %135, %134 : vector<2x32xf32>
    %137 = arith.divf %135, %136 : vector<2x32xf32>
    %138 = vector.extract_strided_slice %114 {offsets = [0, 64], sizes = [2, 32], strides = [1, 1]} : vector<2x96xf32> to vector<2x32xf32>
    %139 = vector.broadcast %6 : vector<1x32xf32> to vector<2x32xf32>
    %140 = arith.addf %138, %139 : vector<2x32xf32>
    %141 = arith.mulf %130, %140 : vector<2x32xf32>
    %142 = arith.addf %123, %141 : vector<2x32xf32>
    %143 = math.tanh %142 : vector<2x32xf32>
    %cst_64 = arith.constant 1.000000e+00 : f32
    %144 = vector.broadcast %cst_64 : f32 to vector<2x32xf32>
    %145 = arith.subf %144, %137 : vector<2x32xf32>
    %146 = arith.mulf %145, %143 : vector<2x32xf32>
    %147 = arith.mulf %137, %103 : vector<2x32xf32>
    %148 = arith.addf %146, %147 : vector<2x32xf32>
    %149 = vector.broadcast %c2_i32 : i32 to vector<2x1xi32>
    %150 = arith.cmpi sgt, %11, %149 : vector<2x1xi32>
    %151 = vector.shape_cast %150 : vector<2x1xi1> to vector<2x1xi1>
    %152 = vector.broadcast %151 : vector<2x1xi1> to vector<2x32xi1>
    %153 = arith.select %152, %148, %103 : vector<2x32xi1>, vector<2x32xf32>
    %cst_65 = arith.constant 0.000000e+00 : f32
    %154 = vector.shape_cast %150 : vector<2x1xi1> to vector<2x1xi1>
    %155 = vector.broadcast %154 : vector<2x1xi1> to vector<2x32xi1>
    %156 = vector.broadcast %cst_65 : f32 to vector<2x32xf32>
    %157 = arith.select %155, %153, %156 : vector<2x32xi1>, vector<2x32xf32>
    %158 = arith.truncf %157 : vector<2x32xf32> to vector<2x32xbf16>
    %c0_66 = arith.constant 0 : index
    %159 = arith.index_cast %c2_i32 : i32 to index
    %c0_67 = arith.constant 0 : index
    %c0_68 = arith.constant 0 : index
    %160 = vector.load %arg6[%c0_66, %159, %c0_67, %c0_68] : memref<1x8x2x32xbf16, #tpu.memory_space<vmem>>, vector<1x1x2x32xbf16>
    %161 = vector.shape_cast %160 : vector<1x1x2x32xbf16> to vector<2x32xbf16>
    %162 = vector.shape_cast %158 : vector<2x32xbf16> to vector<1x1x2x32xbf16>
    tpu.vector_store %arg6[%c0_66, %159, %c0_67, %c0_68], %162 {strides = array<i32>} : memref<1x8x2x32xbf16, #tpu.memory_space<vmem>>, vector<1x1x2x32xbf16>,
    %c3_i32 = arith.constant 3 : i32
    %163 = arith.truncf %153 : vector<2x32xf32> to vector<2x32xbf16>
    %cst_69 = arith.constant dense<0.000000e+00> : vector<2x96xf32>
    %164 = tpu.matmul %163, %4, %cst_69 {dimension_numbers = #tpu.dot_dimension_numbers<[1], [0], [0], [1], [0, 0, 1, 1], [], []>} : vector<2x32xbf16>, vector<32x96xbf16>, vector<2x96xf32> -> vector<2x96xf32>
    %c0_70 = arith.constant 0 : index
    %c0_71 = arith.constant 0 : index
    %165 = arith.index_cast %c3_i32 : i32 to index
    %c0_72 = arith.constant 0 : index
    %c0_73 = arith.constant 0 : index
    %166 = vector.load %arg2[%c0_70, %c0_71, %165, %c0_72, %c0_73] : memref<1x3x8x2x32xf32, #tpu.memory_space<vmem>>, vector<1x1x1x2x32xf32>
    %167 = vector.shape_cast %166 : vector<1x1x1x2x32xf32> to vector<2x32xf32>
    %c0_74 = arith.constant 0 : index
    %c1_75 = arith.constant 1 : index
    %168 = arith.index_cast %c3_i32 : i32 to index
    %c0_76 = arith.constant 0 : index
    %c0_77 = arith.constant 0 : index
    %169 = vector.load %arg2[%c0_74, %c1_75, %168, %c0_76, %c0_77] : memref<1x3x8x2x32xf32, #tpu.memory_space<vmem>>, vector<1x1x1x2x32xf32>
    %170 = vector.shape_cast %169 : vector<1x1x1x2x32xf32> to vector<2x32xf32>
    %c0_78 = arith.constant 0 : index
    %c2_79 = arith.constant 2 : index
    %171 = arith.index_cast %c3_i32 : i32 to index
    %c0_80 = arith.constant 0 : index
    %c0_81 = arith.constant 0 : index
    %172 = vector.load %arg2[%c0_78, %c2_79, %171, %c0_80, %c0_81] : memref<1x3x8x2x32xf32, #tpu.memory_space<vmem>>, vector<1x1x1x2x32xf32>
    %173 = vector.shape_cast %172 : vector<1x1x1x2x32xf32> to vector<2x32xf32>
    %174 = vector.extract_strided_slice %164 {offsets = [0, 0], sizes = [2, 32], strides = [1, 1]} : vector<2x96xf32> to vector<2x32xf32>
    %175 = arith.addf %167, %174 : vector<2x32xf32>
    %176 = arith.negf %175 : vector<2x32xf32>
    %177 = math.exp %176 : vector<2x32xf32>
    %cst_82 = arith.constant 1.000000e+00 : f32
    %178 = vector.broadcast %cst_82 : f32 to vector<2x32xf32>
    %179 = arith.addf %178, %177 : vector<2x32xf32>
    %180 = arith.divf %178, %179 : vector<2x32xf32>
    %181 = vector.extract_strided_slice %164 {offsets = [0, 32], sizes = [2, 32], strides = [1, 1]} : vector<2x96xf32> to vector<2x32xf32>
    %182 = arith.addf %170, %181 : vector<2x32xf32>
    %183 = arith.negf %182 : vector<2x32xf32>
    %184 = math.exp %183 : vector<2x32xf32>
    %cst_83 = arith.constant 1.000000e+00 : f32
    %185 = vector.broadcast %cst_83 : f32 to vector<2x32xf32>
    %186 = arith.addf %185, %184 : vector<2x32xf32>
    %187 = arith.divf %185, %186 : vector<2x32xf32>
    %188 = vector.extract_strided_slice %164 {offsets = [0, 64], sizes = [2, 32], strides = [1, 1]} : vector<2x96xf32> to vector<2x32xf32>
    %189 = vector.broadcast %6 : vector<1x32xf32> to vector<2x32xf32>
    %190 = arith.addf %188, %189 : vector<2x32xf32>
    %191 = arith.mulf %180, %190 : vector<2x32xf32>
    %192 = arith.addf %173, %191 : vector<2x32xf32>
    %193 = math.tanh %192 : vector<2x32xf32>
    %cst_84 = arith.constant 1.000000e+00 : f32
    %194 = vector.broadcast %cst_84 : f32 to vector<2x32xf32>
    %195 = arith.subf %194, %187 : vector<2x32xf32>
    %196 = arith.mulf %195, %193 : vector<2x32xf32>
    %197 = arith.mulf %187, %153 : vector<2x32xf32>
    %198 = arith.addf %196, %197 : vector<2x32xf32>
    %199 = vector.broadcast %c3_i32 : i32 to vector<2x1xi32>
    %200 = arith.cmpi sgt, %11, %199 : vector<2x1xi32>
    %201 = vector.shape_cast %200 : vector<2x1xi1> to vector<2x1xi1>
    %202 = vector.broadcast %201 : vector<2x1xi1> to vector<2x32xi1>
    %203 = arith.select %202, %198, %153 : vector<2x32xi1>, vector<2x32xf32>
    %cst_85 = arith.constant 0.000000e+00 : f32
    %204 = vector.shape_cast %200 : vector<2x1xi1> to vector<2x1xi1>
    %205 = vector.broadcast %204 : vector<2x1xi1> to vector<2x32xi1>
    %206 = vector.broadcast %cst_85 : f32 to vector<2x32xf32>
    %207 = arith.select %205, %203, %206 : vector<2x32xi1>, vector<2x32xf32>
    %208 = arith.truncf %207 : vector<2x32xf32> to vector<2x32xbf16>
    %c0_86 = arith.constant 0 : index
    %209 = arith.index_cast %c3_i32 : i32 to index
    %c0_87 = arith.constant 0 : index
    %c0_88 = arith.constant 0 : index
    %210 = vector.load %arg6[%c0_86, %209, %c0_87, %c0_88] : memref<1x8x2x32xbf16, #tpu.memory_space<vmem>>, vector<1x1x2x32xbf16>
    %211 = vector.shape_cast %210 : vector<1x1x2x32xbf16> to vector<2x32xbf16>
    %212 = vector.shape_cast %208 : vector<2x32xbf16> to vector<1x1x2x32xbf16>
    tpu.vector_store %arg6[%c0_86, %209, %c0_87, %c0_88], %212 {strides = array<i32>} : memref<1x8x2x32xbf16, #tpu.memory_space<vmem>>, vector<1x1x2x32xbf16>,
    %c4_i32 = arith.constant 4 : i32
    %213 = arith.truncf %203 : vector<2x32xf32> to vector<2x32xbf16>
    %cst_89 = arith.constant dense<0.000000e+00> : vector<2x96xf32>
    %214 = tpu.matmul %213, %4, %cst_89 {dimension_numbers = #tpu.dot_dimension_numbers<[1], [0], [0], [1], [0, 0, 1, 1], [], []>} : vector<2x32xbf16>, vector<32x96xbf16>, vector<2x96xf32> -> vector<2x96xf32>
    %c0_90 = arith.constant 0 : index
    %c0_91 = arith.constant 0 : index
    %215 = arith.index_cast %c4_i32 : i32 to index
    %c0_92 = arith.constant 0 : index
    %c0_93 = arith.constant 0 : index
    %216 = vector.load %arg2[%c0_90, %c0_91, %215, %c0_92, %c0_93] : memref<1x3x8x2x32xf32, #tpu.memory_space<vmem>>, vector<1x1x1x2x32xf32>
    %217 = vector.shape_cast %216 : vector<1x1x1x2x32xf32> to vector<2x32xf32>
    %c0_94 = arith.constant 0 : index
    %c1_95 = arith.constant 1 : index
    %218 = arith.index_cast %c4_i32 : i32 to index
    %c0_96 = arith.constant 0 : index
    %c0_97 = arith.constant 0 : index
    %219 = vector.load %arg2[%c0_94, %c1_95, %218, %c0_96, %c0_97] : memref<1x3x8x2x32xf32, #tpu.memory_space<vmem>>, vector<1x1x1x2x32xf32>
    %220 = vector.shape_cast %219 : vector<1x1x1x2x32xf32> to vector<2x32xf32>
    %c0_98 = arith.constant 0 : index
    %c2_99 = arith.constant 2 : index
    %221 = arith.index_cast %c4_i32 : i32 to index
    %c0_100 = arith.constant 0 : index
    %c0_101 = arith.constant 0 : index
    %222 = vector.load %arg2[%c0_98, %c2_99, %221, %c0_100, %c0_101] : memref<1x3x8x2x32xf32, #tpu.memory_space<vmem>>, vector<1x1x1x2x32xf32>
    %223 = vector.shape_cast %222 : vector<1x1x1x2x32xf32> to vector<2x32xf32>
    %224 = vector.extract_strided_slice %214 {offsets = [0, 0], sizes = [2, 32], strides = [1, 1]} : vector<2x96xf32> to vector<2x32xf32>
    %225 = arith.addf %217, %224 : vector<2x32xf32>
    %226 = arith.negf %225 : vector<2x32xf32>
    %227 = math.exp %226 : vector<2x32xf32>
    %cst_102 = arith.constant 1.000000e+00 : f32
    %228 = vector.broadcast %cst_102 : f32 to vector<2x32xf32>
    %229 = arith.addf %228, %227 : vector<2x32xf32>
    %230 = arith.divf %228, %229 : vector<2x32xf32>
    %231 = vector.extract_strided_slice %214 {offsets = [0, 32], sizes = [2, 32], strides = [1, 1]} : vector<2x96xf32> to vector<2x32xf32>
    %232 = arith.addf %220, %231 : vector<2x32xf32>
    %233 = arith.negf %232 : vector<2x32xf32>
    %234 = math.exp %233 : vector<2x32xf32>
    %cst_103 = arith.constant 1.000000e+00 : f32
    %235 = vector.broadcast %cst_103 : f32 to vector<2x32xf32>
    %236 = arith.addf %235, %234 : vector<2x32xf32>
    %237 = arith.divf %235, %236 : vector<2x32xf32>
    %238 = vector.extract_strided_slice %214 {offsets = [0, 64], sizes = [2, 32], strides = [1, 1]} : vector<2x96xf32> to vector<2x32xf32>
    %239 = vector.broadcast %6 : vector<1x32xf32> to vector<2x32xf32>
    %240 = arith.addf %238, %239 : vector<2x32xf32>
    %241 = arith.mulf %230, %240 : vector<2x32xf32>
    %242 = arith.addf %223, %241 : vector<2x32xf32>
    %243 = math.tanh %242 : vector<2x32xf32>
    %cst_104 = arith.constant 1.000000e+00 : f32
    %244 = vector.broadcast %cst_104 : f32 to vector<2x32xf32>
    %245 = arith.subf %244, %237 : vector<2x32xf32>
    %246 = arith.mulf %245, %243 : vector<2x32xf32>
    %247 = arith.mulf %237, %203 : vector<2x32xf32>
    %248 = arith.addf %246, %247 : vector<2x32xf32>
    %249 = vector.broadcast %c4_i32 : i32 to vector<2x1xi32>
    %250 = arith.cmpi sgt, %11, %249 : vector<2x1xi32>
    %251 = vector.shape_cast %250 : vector<2x1xi1> to vector<2x1xi1>
    %252 = vector.broadcast %251 : vector<2x1xi1> to vector<2x32xi1>
    %253 = arith.select %252, %248, %203 : vector<2x32xi1>, vector<2x32xf32>
    %cst_105 = arith.constant 0.000000e+00 : f32
    %254 = vector.shape_cast %250 : vector<2x1xi1> to vector<2x1xi1>
    %255 = vector.broadcast %254 : vector<2x1xi1> to vector<2x32xi1>
    %256 = vector.broadcast %cst_105 : f32 to vector<2x32xf32>
    %257 = arith.select %255, %253, %256 : vector<2x32xi1>, vector<2x32xf32>
    %258 = arith.truncf %257 : vector<2x32xf32> to vector<2x32xbf16>
    %c0_106 = arith.constant 0 : index
    %259 = arith.index_cast %c4_i32 : i32 to index
    %c0_107 = arith.constant 0 : index
    %c0_108 = arith.constant 0 : index
    %260 = vector.load %arg6[%c0_106, %259, %c0_107, %c0_108] : memref<1x8x2x32xbf16, #tpu.memory_space<vmem>>, vector<1x1x2x32xbf16>
    %261 = vector.shape_cast %260 : vector<1x1x2x32xbf16> to vector<2x32xbf16>
    %262 = vector.shape_cast %258 : vector<2x32xbf16> to vector<1x1x2x32xbf16>
    tpu.vector_store %arg6[%c0_106, %259, %c0_107, %c0_108], %262 {strides = array<i32>} : memref<1x8x2x32xbf16, #tpu.memory_space<vmem>>, vector<1x1x2x32xbf16>,
    %c5_i32 = arith.constant 5 : i32
    %263 = arith.truncf %253 : vector<2x32xf32> to vector<2x32xbf16>
    %cst_109 = arith.constant dense<0.000000e+00> : vector<2x96xf32>
    %264 = tpu.matmul %263, %4, %cst_109 {dimension_numbers = #tpu.dot_dimension_numbers<[1], [0], [0], [1], [0, 0, 1, 1], [], []>} : vector<2x32xbf16>, vector<32x96xbf16>, vector<2x96xf32> -> vector<2x96xf32>
    %c0_110 = arith.constant 0 : index
    %c0_111 = arith.constant 0 : index
    %265 = arith.index_cast %c5_i32 : i32 to index
    %c0_112 = arith.constant 0 : index
    %c0_113 = arith.constant 0 : index
    %266 = vector.load %arg2[%c0_110, %c0_111, %265, %c0_112, %c0_113] : memref<1x3x8x2x32xf32, #tpu.memory_space<vmem>>, vector<1x1x1x2x32xf32>
    %267 = vector.shape_cast %266 : vector<1x1x1x2x32xf32> to vector<2x32xf32>
    %c0_114 = arith.constant 0 : index
    %c1_115 = arith.constant 1 : index
    %268 = arith.index_cast %c5_i32 : i32 to index
    %c0_116 = arith.constant 0 : index
    %c0_117 = arith.constant 0 : index
    %269 = vector.load %arg2[%c0_114, %c1_115, %268, %c0_116, %c0_117] : memref<1x3x8x2x32xf32, #tpu.memory_space<vmem>>, vector<1x1x1x2x32xf32>
    %270 = vector.shape_cast %269 : vector<1x1x1x2x32xf32> to vector<2x32xf32>
    %c0_118 = arith.constant 0 : index
    %c2_119 = arith.constant 2 : index
    %271 = arith.index_cast %c5_i32 : i32 to index
    %c0_120 = arith.constant 0 : index
    %c0_121 = arith.constant 0 : index
    %272 = vector.load %arg2[%c0_118, %c2_119, %271, %c0_120, %c0_121] : memref<1x3x8x2x32xf32, #tpu.memory_space<vmem>>, vector<1x1x1x2x32xf32>
    %273 = vector.shape_cast %272 : vector<1x1x1x2x32xf32> to vector<2x32xf32>
    %274 = vector.extract_strided_slice %264 {offsets = [0, 0], sizes = [2, 32], strides = [1, 1]} : vector<2x96xf32> to vector<2x32xf32>
    %275 = arith.addf %267, %274 : vector<2x32xf32>
    %276 = arith.negf %275 : vector<2x32xf32>
    %277 = math.exp %276 : vector<2x32xf32>
    %cst_122 = arith.constant 1.000000e+00 : f32
    %278 = vector.broadcast %cst_122 : f32 to vector<2x32xf32>
    %279 = arith.addf %278, %277 : vector<2x32xf32>
    %280 = arith.divf %278, %279 : vector<2x32xf32>
    %281 = vector.extract_strided_slice %264 {offsets = [0, 32], sizes = [2, 32], strides = [1, 1]} : vector<2x96xf32> to vector<2x32xf32>
    %282 = arith.addf %270, %281 : vector<2x32xf32>
    %283 = arith.negf %282 : vector<2x32xf32>
    %284 = math.exp %283 : vector<2x32xf32>
    %cst_123 = arith.constant 1.000000e+00 : f32
    %285 = vector.broadcast %cst_123 : f32 to vector<2x32xf32>
    %286 = arith.addf %285, %284 : vector<2x32xf32>
    %287 = arith.divf %285, %286 : vector<2x32xf32>
    %288 = vector.extract_strided_slice %264 {offsets = [0, 64], sizes = [2, 32], strides = [1, 1]} : vector<2x96xf32> to vector<2x32xf32>
    %289 = vector.broadcast %6 : vector<1x32xf32> to vector<2x32xf32>
    %290 = arith.addf %288, %289 : vector<2x32xf32>
    %291 = arith.mulf %280, %290 : vector<2x32xf32>
    %292 = arith.addf %273, %291 : vector<2x32xf32>
    %293 = math.tanh %292 : vector<2x32xf32>
    %cst_124 = arith.constant 1.000000e+00 : f32
    %294 = vector.broadcast %cst_124 : f32 to vector<2x32xf32>
    %295 = arith.subf %294, %287 : vector<2x32xf32>
    %296 = arith.mulf %295, %293 : vector<2x32xf32>
    %297 = arith.mulf %287, %253 : vector<2x32xf32>
    %298 = arith.addf %296, %297 : vector<2x32xf32>
    %299 = vector.broadcast %c5_i32 : i32 to vector<2x1xi32>
    %300 = arith.cmpi sgt, %11, %299 : vector<2x1xi32>
    %301 = vector.shape_cast %300 : vector<2x1xi1> to vector<2x1xi1>
    %302 = vector.broadcast %301 : vector<2x1xi1> to vector<2x32xi1>
    %303 = arith.select %302, %298, %253 : vector<2x32xi1>, vector<2x32xf32>
    %cst_125 = arith.constant 0.000000e+00 : f32
    %304 = vector.shape_cast %300 : vector<2x1xi1> to vector<2x1xi1>
    %305 = vector.broadcast %304 : vector<2x1xi1> to vector<2x32xi1>
    %306 = vector.broadcast %cst_125 : f32 to vector<2x32xf32>
    %307 = arith.select %305, %303, %306 : vector<2x32xi1>, vector<2x32xf32>
    %308 = arith.truncf %307 : vector<2x32xf32> to vector<2x32xbf16>
    %c0_126 = arith.constant 0 : index
    %309 = arith.index_cast %c5_i32 : i32 to index
    %c0_127 = arith.constant 0 : index
    %c0_128 = arith.constant 0 : index
    %310 = vector.load %arg6[%c0_126, %309, %c0_127, %c0_128] : memref<1x8x2x32xbf16, #tpu.memory_space<vmem>>, vector<1x1x2x32xbf16>
    %311 = vector.shape_cast %310 : vector<1x1x2x32xbf16> to vector<2x32xbf16>
    %312 = vector.shape_cast %308 : vector<2x32xbf16> to vector<1x1x2x32xbf16>
    tpu.vector_store %arg6[%c0_126, %309, %c0_127, %c0_128], %312 {strides = array<i32>} : memref<1x8x2x32xbf16, #tpu.memory_space<vmem>>, vector<1x1x2x32xbf16>,
    %c6_i32 = arith.constant 6 : i32
    %313 = arith.truncf %303 : vector<2x32xf32> to vector<2x32xbf16>
    %cst_129 = arith.constant dense<0.000000e+00> : vector<2x96xf32>
    %314 = tpu.matmul %313, %4, %cst_129 {dimension_numbers = #tpu.dot_dimension_numbers<[1], [0], [0], [1], [0, 0, 1, 1], [], []>} : vector<2x32xbf16>, vector<32x96xbf16>, vector<2x96xf32> -> vector<2x96xf32>
    %c0_130 = arith.constant 0 : index
    %c0_131 = arith.constant 0 : index
    %315 = arith.index_cast %c6_i32 : i32 to index
    %c0_132 = arith.constant 0 : index
    %c0_133 = arith.constant 0 : index
    %316 = vector.load %arg2[%c0_130, %c0_131, %315, %c0_132, %c0_133] : memref<1x3x8x2x32xf32, #tpu.memory_space<vmem>>, vector<1x1x1x2x32xf32>
    %317 = vector.shape_cast %316 : vector<1x1x1x2x32xf32> to vector<2x32xf32>
    %c0_134 = arith.constant 0 : index
    %c1_135 = arith.constant 1 : index
    %318 = arith.index_cast %c6_i32 : i32 to index
    %c0_136 = arith.constant 0 : index
    %c0_137 = arith.constant 0 : index
    %319 = vector.load %arg2[%c0_134, %c1_135, %318, %c0_136, %c0_137] : memref<1x3x8x2x32xf32, #tpu.memory_space<vmem>>, vector<1x1x1x2x32xf32>
    %320 = vector.shape_cast %319 : vector<1x1x1x2x32xf32> to vector<2x32xf32>
    %c0_138 = arith.constant 0 : index
    %c2_139 = arith.constant 2 : index
    %321 = arith.index_cast %c6_i32 : i32 to index
    %c0_140 = arith.constant 0 : index
    %c0_141 = arith.constant 0 : index
    %322 = vector.load %arg2[%c0_138, %c2_139, %321, %c0_140, %c0_141] : memref<1x3x8x2x32xf32, #tpu.memory_space<vmem>>, vector<1x1x1x2x32xf32>
    %323 = vector.shape_cast %322 : vector<1x1x1x2x32xf32> to vector<2x32xf32>
    %324 = vector.extract_strided_slice %314 {offsets = [0, 0], sizes = [2, 32], strides = [1, 1]} : vector<2x96xf32> to vector<2x32xf32>
    %325 = arith.addf %317, %324 : vector<2x32xf32>
    %326 = arith.negf %325 : vector<2x32xf32>
    %327 = math.exp %326 : vector<2x32xf32>
    %cst_142 = arith.constant 1.000000e+00 : f32
    %328 = vector.broadcast %cst_142 : f32 to vector<2x32xf32>
    %329 = arith.addf %328, %327 : vector<2x32xf32>
    %330 = arith.divf %328, %329 : vector<2x32xf32>
    %331 = vector.extract_strided_slice %314 {offsets = [0, 32], sizes = [2, 32], strides = [1, 1]} : vector<2x96xf32> to vector<2x32xf32>
    %332 = arith.addf %320, %331 : vector<2x32xf32>
    %333 = arith.negf %332 : vector<2x32xf32>
    %334 = math.exp %333 : vector<2x32xf32>
    %cst_143 = arith.constant 1.000000e+00 : f32
    %335 = vector.broadcast %cst_143 : f32 to vector<2x32xf32>
    %336 = arith.addf %335, %334 : vector<2x32xf32>
    %337 = arith.divf %335, %336 : vector<2x32xf32>
    %338 = vector.extract_strided_slice %314 {offsets = [0, 64], sizes = [2, 32], strides = [1, 1]} : vector<2x96xf32> to vector<2x32xf32>
    %339 = vector.broadcast %6 : vector<1x32xf32> to vector<2x32xf32>
    %340 = arith.addf %338, %339 : vector<2x32xf32>
    %341 = arith.mulf %330, %340 : vector<2x32xf32>
    %342 = arith.addf %323, %341 : vector<2x32xf32>
    %343 = math.tanh %342 : vector<2x32xf32>
    %cst_144 = arith.constant 1.000000e+00 : f32
    %344 = vector.broadcast %cst_144 : f32 to vector<2x32xf32>
    %345 = arith.subf %344, %337 : vector<2x32xf32>
    %346 = arith.mulf %345, %343 : vector<2x32xf32>
    %347 = arith.mulf %337, %303 : vector<2x32xf32>
    %348 = arith.addf %346, %347 : vector<2x32xf32>
    %349 = vector.broadcast %c6_i32 : i32 to vector<2x1xi32>
    %350 = arith.cmpi sgt, %11, %349 : vector<2x1xi32>
    %351 = vector.shape_cast %350 : vector<2x1xi1> to vector<2x1xi1>
    %352 = vector.broadcast %351 : vector<2x1xi1> to vector<2x32xi1>
    %353 = arith.select %352, %348, %303 : vector<2x32xi1>, vector<2x32xf32>
    %cst_145 = arith.constant 0.000000e+00 : f32
    %354 = vector.shape_cast %350 : vector<2x1xi1> to vector<2x1xi1>
    %355 = vector.broadcast %354 : vector<2x1xi1> to vector<2x32xi1>
    %356 = vector.broadcast %cst_145 : f32 to vector<2x32xf32>
    %357 = arith.select %355, %353, %356 : vector<2x32xi1>, vector<2x32xf32>
    %358 = arith.truncf %357 : vector<2x32xf32> to vector<2x32xbf16>
    %c0_146 = arith.constant 0 : index
    %359 = arith.index_cast %c6_i32 : i32 to index
    %c0_147 = arith.constant 0 : index
    %c0_148 = arith.constant 0 : index
    %360 = vector.load %arg6[%c0_146, %359, %c0_147, %c0_148] : memref<1x8x2x32xbf16, #tpu.memory_space<vmem>>, vector<1x1x2x32xbf16>
    %361 = vector.shape_cast %360 : vector<1x1x2x32xbf16> to vector<2x32xbf16>
    %362 = vector.shape_cast %358 : vector<2x32xbf16> to vector<1x1x2x32xbf16>
    tpu.vector_store %arg6[%c0_146, %359, %c0_147, %c0_148], %362 {strides = array<i32>} : memref<1x8x2x32xbf16, #tpu.memory_space<vmem>>, vector<1x1x2x32xbf16>,
    %c7_i32 = arith.constant 7 : i32
    %363 = arith.truncf %353 : vector<2x32xf32> to vector<2x32xbf16>
    %cst_149 = arith.constant dense<0.000000e+00> : vector<2x96xf32>
    %364 = tpu.matmul %363, %4, %cst_149 {dimension_numbers = #tpu.dot_dimension_numbers<[1], [0], [0], [1], [0, 0, 1, 1], [], []>} : vector<2x32xbf16>, vector<32x96xbf16>, vector<2x96xf32> -> vector<2x96xf32>
    %c0_150 = arith.constant 0 : index
    %c0_151 = arith.constant 0 : index
    %365 = arith.index_cast %c7_i32 : i32 to index
    %c0_152 = arith.constant 0 : index
    %c0_153 = arith.constant 0 : index
    %366 = vector.load %arg2[%c0_150, %c0_151, %365, %c0_152, %c0_153] : memref<1x3x8x2x32xf32, #tpu.memory_space<vmem>>, vector<1x1x1x2x32xf32>
    %367 = vector.shape_cast %366 : vector<1x1x1x2x32xf32> to vector<2x32xf32>
    %c0_154 = arith.constant 0 : index
    %c1_155 = arith.constant 1 : index
    %368 = arith.index_cast %c7_i32 : i32 to index
    %c0_156 = arith.constant 0 : index
    %c0_157 = arith.constant 0 : index
    %369 = vector.load %arg2[%c0_154, %c1_155, %368, %c0_156, %c0_157] : memref<1x3x8x2x32xf32, #tpu.memory_space<vmem>>, vector<1x1x1x2x32xf32>
    %370 = vector.shape_cast %369 : vector<1x1x1x2x32xf32> to vector<2x32xf32>
    %c0_158 = arith.constant 0 : index
    %c2_159 = arith.constant 2 : index
    %371 = arith.index_cast %c7_i32 : i32 to index
    %c0_160 = arith.constant 0 : index
    %c0_161 = arith.constant 0 : index
    %372 = vector.load %arg2[%c0_158, %c2_159, %371, %c0_160, %c0_161] : memref<1x3x8x2x32xf32, #tpu.memory_space<vmem>>, vector<1x1x1x2x32xf32>
    %373 = vector.shape_cast %372 : vector<1x1x1x2x32xf32> to vector<2x32xf32>
    %374 = vector.extract_strided_slice %364 {offsets = [0, 0], sizes = [2, 32], strides = [1, 1]} : vector<2x96xf32> to vector<2x32xf32>
    %375 = arith.addf %367, %374 : vector<2x32xf32>
    %376 = arith.negf %375 : vector<2x32xf32>
    %377 = math.exp %376 : vector<2x32xf32>
    %cst_162 = arith.constant 1.000000e+00 : f32
    %378 = vector.broadcast %cst_162 : f32 to vector<2x32xf32>
    %379 = arith.addf %378, %377 : vector<2x32xf32>
    %380 = arith.divf %378, %379 : vector<2x32xf32>
    %381 = vector.extract_strided_slice %364 {offsets = [0, 32], sizes = [2, 32], strides = [1, 1]} : vector<2x96xf32> to vector<2x32xf32>
    %382 = arith.addf %370, %381 : vector<2x32xf32>
    %383 = arith.negf %382 : vector<2x32xf32>
    %384 = math.exp %383 : vector<2x32xf32>
    %cst_163 = arith.constant 1.000000e+00 : f32
    %385 = vector.broadcast %cst_163 : f32 to vector<2x32xf32>
    %386 = arith.addf %385, %384 : vector<2x32xf32>
    %387 = arith.divf %385, %386 : vector<2x32xf32>
    %388 = vector.extract_strided_slice %364 {offsets = [0, 64], sizes = [2, 32], strides = [1, 1]} : vector<2x96xf32> to vector<2x32xf32>
    %389 = vector.broadcast %6 : vector<1x32xf32> to vector<2x32xf32>
    %390 = arith.addf %388, %389 : vector<2x32xf32>
    %391 = arith.mulf %380, %390 : vector<2x32xf32>
    %392 = arith.addf %373, %391 : vector<2x32xf32>
    %393 = math.tanh %392 : vector<2x32xf32>
    %cst_164 = arith.constant 1.000000e+00 : f32
    %394 = vector.broadcast %cst_164 : f32 to vector<2x32xf32>
    %395 = arith.subf %394, %387 : vector<2x32xf32>
    %396 = arith.mulf %395, %393 : vector<2x32xf32>
    %397 = arith.mulf %387, %353 : vector<2x32xf32>
    %398 = arith.addf %396, %397 : vector<2x32xf32>
    %399 = vector.broadcast %c7_i32 : i32 to vector<2x1xi32>
    %400 = arith.cmpi sgt, %11, %399 : vector<2x1xi32>
    %401 = vector.shape_cast %400 : vector<2x1xi1> to vector<2x1xi1>
    %402 = vector.broadcast %401 : vector<2x1xi1> to vector<2x32xi1>
    %403 = arith.select %402, %398, %353 : vector<2x32xi1>, vector<2x32xf32>
    %cst_165 = arith.constant 0.000000e+00 : f32
    %404 = vector.shape_cast %400 : vector<2x1xi1> to vector<2x1xi1>
    %405 = vector.broadcast %404 : vector<2x1xi1> to vector<2x32xi1>
    %406 = vector.broadcast %cst_165 : f32 to vector<2x32xf32>
    %407 = arith.select %405, %403, %406 : vector<2x32xi1>, vector<2x32xf32>
    %408 = arith.truncf %407 : vector<2x32xf32> to vector<2x32xbf16>
    %c0_166 = arith.constant 0 : index
    %409 = arith.index_cast %c7_i32 : i32 to index
    %c0_167 = arith.constant 0 : index
    %c0_168 = arith.constant 0 : index
    %410 = vector.load %arg6[%c0_166, %409, %c0_167, %c0_168] : memref<1x8x2x32xbf16, #tpu.memory_space<vmem>>, vector<1x1x2x32xbf16>
    %411 = vector.shape_cast %410 : vector<1x1x2x32xbf16> to vector<2x32xbf16>
    %412 = vector.shape_cast %408 : vector<2x32xbf16> to vector<1x1x2x32xbf16>
    tpu.vector_store %arg6[%c0_166, %409, %c0_167, %c0_168], %412 {strides = array<i32>} : memref<1x8x2x32xbf16, #tpu.memory_space<vmem>>, vector<1x1x2x32xbf16>,
    %c8_i32_169 = arith.constant 8 : i32
    %c0_170 = arith.constant 0 : index
    %c0_171 = arith.constant 0 : index
    %413 = vector.load %arg8[%c0_170, %c0_171] : memref<2x32xf32, #tpu.memory_space<vmem>>, vector<2x32xf32>
    tpu.vector_store %arg8[%c0_170, %c0_171], %403 {strides = array<i32>} : memref<2x32xf32, #tpu.memory_space<vmem>>, vector<2x32xf32>,
    %c0_172 = arith.constant 0 : index
    %c0_173 = arith.constant 0 : index
    %c0_174 = arith.constant 0 : index
    %414 = vector.load %arg7[%c0_172, %c0_173, %c0_174] : memref<1x2x32xf32, #tpu.memory_space<vmem>>, vector<1x2x32xf32>
    %415 = vector.shape_cast %414 : vector<1x2x32xf32> to vector<2x32xf32>
    %416 = vector.shape_cast %403 : vector<2x32xf32> to vector<1x2x32xf32>
    tpu.vector_store %arg7[%c0_172, %c0_173, %c0_174], %416 {strides = array<i32>} : memref<1x2x32xf32, #tpu.memory_space<vmem>>, vector<1x2x32xf32>,
    return
  }
  func.func @transform_0(%arg0: i32, %arg1: i32) -> (i32, i32, i32, i32, i32) {
    %c0_i32 = arith.constant 0 : i32
    %c0_i32_0 = arith.constant 0 : i32
    %c0_i32_1 = arith.constant 0 : i32
    %c0_i32_2 = arith.constant 0 : i32
    return %arg0, %c0_i32, %arg1, %c0_i32_0, %c0_i32_1 : i32, i32, i32, i32, i32
  }
  func.func @transform_1(%arg0: i32, %arg1: i32) -> (i32, i32, i32) {
    %c0_i32 = arith.constant 0 : i32
    %c0_i32_0 = arith.constant 0 : i32
    %c0_i32_1 = arith.constant 0 : i32
    return %arg0, %c0_i32, %c0_i32_0 : i32, i32, i32
  }
  func.func @transform_2(%arg0: i32, %arg1: i32) -> (i32, i32, i32) {
    %c0_i32 = arith.constant 0 : i32
    %c0_i32_0 = arith.constant 0 : i32
    %c0_i32_1 = arith.constant 0 : i32
    return %arg0, %c0_i32, %c0_i32_0 : i32, i32, i32
  }
  func.func @transform_3(%arg0: i32, %arg1: i32) -> (i32, i32, i32) {
    %c0_i32 = arith.constant 0 : i32
    %c0_i32_0 = arith.constant 0 : i32
    %c0_i32_1 = arith.constant 0 : i32
    return %arg0, %c0_i32, %c0_i32_0 : i32, i32, i32
  }
  func.func @transform_4(%arg0: i32, %arg1: i32) -> (i32, i32, i32, i32) {
    %c0_i32 = arith.constant 0 : i32
    %c0_i32_0 = arith.constant 0 : i32
    %c0_i32_1 = arith.constant 0 : i32
    return %arg0, %arg1, %c0_i32, %c0_i32_0 : i32, i32, i32, i32
  }
  func.func @transform_5(%arg0: i32, %arg1: i32) -> (i32, i32, i32) {
    %c0_i32 = arith.constant 0 : i32
    %c0_i32_0 = arith.constant 0 : i32
    %c0_i32_1 = arith.constant 0 : i32
    return %arg0, %c0_i32, %c0_i32_0 : i32, i32, i32
  }
}

</mosaic_0001>

<bundles_post_ra>
// kernel: tpu_custom_call.1
= control target key start
LH: loop header
LB: loop body
LE: loop exit
PB: predicated region body
PF: predicated region fallthrough
CT: control target
= control target key end

     0   :  { %s2245_s0 = inlined_call_operand.hbm [shape: f32[2,3,8,2,32], index: 0, kind: input, shape index: {}]   ;;  %s2246_s1 = inlined_call_operand.hbm [shape: bf16[2,32,96], index: 1, kind: input, shape index: {}]   ;;  %s2247_s2 = inlined_call_operand.vmem [shape: f32[2,1,32], index: 2, kind: input, shape index: {}]   ;;  %s2248_s3 = inlined_call_operand.vmem [shape: s32[2,2,1], index: 3, kind: input, shape index: {}]   ;;  %s2249_s4 = inlined_call_operand.hbm [shape: bf16[2,8,2,32], index: 4, kind: output, shape index: {0}]   ;;  %s2250_s5 = inlined_call_operand.hbm [shape: f32[2,2,32], index: 5, kind: output, shape index: {1}]  }
   0x1   :  { %2252 = sst [smem:[#allocation17_spill]] %s2245_s0 }
   0x2   :  { %11 = vsyncpa [#allocation4], 0 }
   0x3   :  { %13 = vsyncpa [#allocation4 + $0x1], 0 }
   0x4   :  { %14 = vsyncpa [#allocation7], 0 }
   0x5   :  { %16 = vsyncpa [#allocation7 + $0x1], 0 }
   0x6   :  { %17 = vsyncpa [#allocation5], 0 }
   0x7   :  { %19 = vsyncpa [#allocation5 + $0x1], 0 }
   0x8   :  { %20 = vsyncpa [#allocation10], 0 }
   0x9   :  { %22 = vsyncpa [#allocation10 + $0x1], 0  ;;  %s1864_s18 = smov 0   ;;  %s1866_s19 = smov 0  }
   0xa   :  { %s1868_s20 = smov 0   ;;  %s1870_s21 = smov 0  }
   0xb   :  { %s1872_s22 = smov 0   ;;  %s1874_s23 = smov 0  }
   0xc LB: > { %s1310_s24 = sadd.s32 4294967295, %s1817_s23   ;;  %s1311_s25 = sadd.s32 4294967294, %s1817_s23   ;;  %s1817_s23 = sphi %s1874_s23, %s28_s23   ;;  %s1813_s22 = sphi %s1872_s22, %s2268_s22   ;;  %s1809_s21 = sphi %s1870_s21, %s2267_s21   ;;  %s1805_s20 = sphi %s1868_s20, %s2266_s20   ;;  %s1801_s19 = sphi %s1866_s19, %s2265_s19   ;;  %s1797_s18 = sphi %s1864_s18, %s2264_s18  }
   0xd   : > { %s40_s26 = sadd.s32 1, %s1813_s22  ;;  %s49_s27 = sadd.s32 1, %s1805_s20 }
   0xe   : > { %p42_p0 = scmp.ge.s32.totalorder %s40_s26, 2  ;;  %p56_p1 = scmp.ne.s32.totalorder %s1805_s20, %s1801_s19 }
   0xf   : > { %p57_p2 = scmp.eq.s32.totalorder %s1817_s23, 0  ;;  %p62_p3 = scmp.ne.s32.totalorder %s1801_s19, %s1797_s18 }
  0x10   : > { %s2270_s26 = smov (%p42_p0, %s40_s26), 0  ;;  %p63_p5 = scmp.eq.s32.totalorder %s1310_s24, 0 }
  0x11   : > { %2253 = sst [smem:[#allocation15_spill]] %s2270_s26  ;;  %p1905_p4 = por %p57_p2, %p56_p1 }
  0x12   : > { %s44_s29 = ssub.s32 %s1813_s22, %s2270_s26  ;;  %p166_p6 = scmp.eq.s32.totalorder %s1310_s24, 1 }
  0x13   : > { %p47_p7 = scmp.eq.s32.totalorder %s44_s29, 0  ;;  %p1911_p8 = por %p63_p5, %p62_p3 }
  0x14   : > { %p1915_p9 = por %p166_p6, %p56_p1  ;;  %p172_p10 = scmp.eq.s32.totalorder %s1311_s25, 1 }
  0x15   : > { %s1920_s7 = scalar_select %p47_p7, %s1805_s20, %s49_s27  }
  0x16   : > { %p1922_p11 = por %p172_p10, %p62_p3  ;;  %p1313_p12 = scmp.ge.s32.totalorder %s1817_s23, 2 }
  0x17   : > { %2257 = sst [smem:[#allocation16_spill]] %s1920_s7  ;;  %p1502_p13 = scmp.lt.s32.totalorder %s1817_s23, 2 }
  0x18   : > { %s1929_s9 = sand.u32 1, %s1805_s20   ;;  %s1478_s11 = smul.u32 768, %s1813_s22 }
  0x19   : > { %s1477_s10 = smul.u32 48, %s1929_s9  ;;  %p1935_p0 = pnand %p1502_p13, %p1905_p4 }
  0x1a   : > { %s2260_s0 = sld [smem:[#allocation17_spill]]  ;;  %p1318_p1 = scmp.ge.s32.totalorder %s1817_s23, 1 }
  0x1b   : > { %s222_s16 = scalar_lea.vmem [#allocation3], %s1477_s10  ;;  %s219_s24 = scalar_lea.sflag [#allocation4], %s1929_s9 }
  0x1c   : > { %s231_s17 = sshll.u32 %s222_s16, 4  ;;  %p1649_p2 = pneg %p1935_p0  ;;  %s232_s17 = int_to_ptr.vmem [resolvable:$true] %s231_s17 }
  0x1d   : > { %s1660_s25 = scalar_lea.vmem %s232_s17, 768  ;;  %s1819_s27 = smov [#allocation3]  }
  0x1e   : > { %p1661_p3 = scmp.ne.s32.totalorder %s232_s17, %s1660_s25  ;;  %s1665_s28 = sshll.u32 %s1819_s27, 4  ;;  %s1666_s28 = int_to_ptr.vmem [resolvable:$false] %s1665_s28 }
  0x1f   : > { %s1667_s29 = scalar_lea.vmem %s1666_s28, 1536  ;;  %p1668_p6 = scmp.lt.s32.totalorder %s232_s17, %s1666_s28 }
  0x20   : > { %s230_s15 = scalar_lea.hbm %s2260_s0, %s1478_s11  ;;  %p1663_p4 = pnand %p1661_p3, %p1649_p2 }
  0x21   : > { %p1669_p7 = scmp.lt.s32.totalorder %s1667_s29, %s1660_s25 }
  0x22   : > { %p1664_p5 = pneg %p1663_p4 }
  0x23   : > { %p1670_p10 = por %p1669_p7, %p1668_p6 }
  0x25   : > { %p1671_p13 = pnand %p1670_p10, %p1664_p5 }
  0x27   : > { %1674 = shalt.err (!%p1671_p13)
}
  0x28   : > { %s1820_s10 = smov 32   ;;  %s1821_s11 = smov 2  }
  0x29   : > { %1491 = dma.hbm_to_vmem [thread:$0]  (!%p1935_p0), %s230_s15, 768, %s232_s17, %s219_s24, %s1820_s10, %s1820_s10, %s1821_s11  }
  0x2a   : > { %p273_p3 = scmp.lt.s32.totalorder %s1817_s23, 3  ;;  %s1315_s13 = sshll.u32 %s1929_s9, 4 }
  0x2b   : > { %s1387_s14 = sshll.u32 %s1813_s22, 8  ;;  %s245_s29 = scalar_lea.vmem [#allocation6], %s1315_s13 }
  0x2c   : > { %p1956_p4 = pnand %p1318_p1, %p273_p3  ;;  %s251_s28 = scalar_lea.hbm %s2246_s1, %s1387_s14 }
  0x2d   : > { %s252_s0 = sshll.u32 %s245_s29, 4  ;;  %s242_s26 = scalar_lea.sflag [#allocation7], %s1929_s9  ;;  %s253_s0 = int_to_ptr.vmem [resolvable:$true] %s252_s0 }
  0x2e   : > { %s1688_s7 = scalar_lea.vmem %s253_s0, 256  ;;  %s1822_s15 = smov [#allocation6]  }
  0x2f   : > { %p1689_p5 = scmp.ne.s32.totalorder %s253_s0, %s1688_s7  ;;  %s1693_s17 = sshll.u32 %s1822_s15, 4  ;;  %s1694_s17 = int_to_ptr.vmem [resolvable:$false] %s1693_s17 }
  0x30   : > { %s1695_s24 = scalar_lea.vmem %s1694_s17, 512  ;;  %p1696_p1 = scmp.lt.s32.totalorder %s253_s0, %s1694_s17 }
  0x31   : > { %p1691_p6 = pnand %p1689_p5, %p1649_p2  ;;  %p1697_p10 = scmp.lt.s32.totalorder %s1695_s24, %s1688_s7 }
  0x33   : > { %p1692_p7 = pneg %p1691_p6  ;;  %p1698_p13 = por %p1697_p10, %p1696_p1 }
  0x35   : > { %p1699_p3 = pnand %p1698_p13, %p1692_p7 }
  0x37   : > { %1702 = shalt.err (!%p1699_p3)
}
  0x38   : > { %s1823_s10 = smov 64   ;;  %s1824_s11 = smov 4  }
  0x39   : > { %1494 = dma.hbm_to_vmem [thread:$0]  (!%p1935_p0), %s251_s28, 256, %s253_s0, %s242_s26, %s1823_s10, %s1823_s10, %s1824_s11  }
  0x3a   : > { %277 = sbr.rel (%p1956_p4) target bundleno = 2920 (0xb68), region = 36  ;;  %s1972_s9 = sand.u32 (!%p1956_p4), 1, %s1801_s19  }
  0x3b   : > { %s1479_s13 = smul.u32 (!%p1956_p4), 48, %s1972_s9  ;;  %s280_s14 = scalar_lea.sflag (!%p1956_p4), [#allocation4], %s1972_s9 }
  0x3d   : > { %s1976_s7 = scalar_lea.vmem (!%p1956_p4), [#allocation3], %s1479_s13 }
  0x3f   : > { %1780 = dma.done.wait (%p1911_p8), %s280_s14, 768  }
  0x40   : > { %1782 = vsyncadd (%p1911_p8), %s280_s14, 4294966528  ;;  %s1319_s0 = sshll.u32 %s1972_s9, 4  ;;  %s289_s26 = scalar_lea.sflag [#allocation7], %s1972_s9 }
  0x41   : > { %s292_s12 = scalar_lea.vmem [#allocation6], %s1319_s0 }
  0x42   : > { %1784 = dma.done.wait (%p1911_p8), %s289_s26, 256  }
  0x43   : > { %1786 = vsyncadd (%p1911_p8), %s289_s26, 4294967040  ;;  %vm350_vm0 = vcmask 254976   ;;  %p337_p0 = scmp.lt.s32.totalorder %s1809_s21, 1  ;;  %v1825_v0 = vmov 0.0   ;;  %vm1826_vm1 = vmmov 0   ;;  %v2004_v1 = vld [vmem:[%s292_s12 + $0x8] sm:$0xff]  }
  0x44   : > { %1413 = vmatprep.subr.bf16.mxu0 %v1825_v0  ;;  %1417 = vmatprep.mubr.msk.bf16.mxu0 %vm1826_vm1, %v1825_v0  ;;  %351 = vst.msk [vmem:[#allocation2] sm:$0x3] %vm350_vm0, %v1825_v0  ;;  %v2007_v2 = vld [vmem:[%s292_s12] sm:$0xff]   ;;  %s1827_s28 = smov 64   ;;  %vm375_vm2 = vcmask 261120   ;;  %v1828_v6 = vmov 0  }
  0x45   : > { %s1995_s16 = scalar_select %p337_p0, %s1809_s21, 1  ;;  %1421 = vmatprep.subr.bf16.mxu1 %v1825_v0  ;;  %1425 = vmatprep.mubr.msk.bf16.mxu1 %vm1826_vm1, %v1825_v0  ;;  %v419_v15 = vld [vmem:[%s1976_s7] sm:$0x3]  ;;  %v1326_v20 = vld [vmem:[%s1976_s7 + $0x10] sm:$0x3]  ;;  %vm471_vm5 = vcmask 253952  }
  0x46   : > { %1414 = vmatpush3.bf16.msra.mxu0 %v2004_v1  ;;  %1422 = vmatpush3.bf16.msra.mxu1 %v2004_v1  ;;  %s1829_s10 = smov 96   ;;  %v1327_v27 = vld [vmem:[%s1976_s7 + $0x20] sm:$0x3]  ;;  %s1320_s11 = sshll.u32 %s1972_s9, 3  ;;  %v1332_v49 = vld [vmem:[%s1976_s7 + $0x2] sm:$0x3] }
  0x47   : > { %s339_s27 = scalar_lea.vmem %s2247_s2, %s1995_s16  ;;  %1415 = vmatprep.subr.bf16.mxu0 %v1825_v0  ;;  %1423 = vmatprep.subr.bf16.mxu1 %v1825_v0  ;;  %s1322_s29 = sshll.u32 %s1995_s16, 1  ;;  %v1333_v54 = vld [vmem:[%s1976_s7 + $0x12] sm:$0x3]  ;;  %v1334_v61 = vld [vmem:[%s1976_s7 + $0x22] sm:$0x3] }
  0x48   : > { %v1330_v4 = vld [vmem:[%s339_s27] ss:$0 sm:$0xff]  ;;  %1563 = vset.pattern.permute.xlu1 %v1828_v6  ;;  %1564 = vset.pattern.permute.xlu0 %v1828_v6  ;;  %s343_s24 = scalar_lea.vmem %s2248_s3, %s1322_s29  ;;  %s2049_s13 = scalar_lea.vmem [#allocation8], %s1320_s11 }
  0x49   : > { %447 = vrot.lane.b32.xlu0 %v1330_v4, %s1827_s28  ;;  %v2034_v7 = vld [vmem:[%s343_s24] sm:$0x3]  ;;  %s1321_s14 = sshll.u32 %s1972_s9, 1  ;;  %s1384_s0 = sshll.u32 %s1809_s21, 5 }
  0x4a   : > { %1416 = vmatpush3.bf16.msra.mxu0 %v2007_v2  ;;  %1424 = vmatpush3.bf16.msra.mxu1 %v2007_v2  ;;  %vm462_vm3 = vcmp.gt.s32.totalorder %v2034_v7, 0  ;;  %vm553_vm6 = vcmp.gt.s32.totalorder %v2034_v7, 1  ;;  %vm644_vm7 = vcmp.gt.s32.totalorder %v2034_v7, 2  ;;  %vm735_vm10 = vcmp.gt.s32.totalorder %v2034_v7, 3  ;;  %s335_s26 = scalar_lea.vmem [#allocation9], %s1321_s14  ;;  %s1388_s16 = sshll.u32 %s1809_s21, 7 }
  0x4b   : > { %v2009_v3 = vld [vmem:[#allocation2] sm:$0x3]  ;;  %1429 = vmatprep.subr.bf16.mxu0 %v1825_v0  ;;  %1437 = vmatprep.subr.bf16.mxu1 %v1825_v0  ;;  %v463_v13 = vsel %vm462_vm3, 1, %v1828_v6  ;;  %v554_v45 = vsel %vm553_vm6, 1, %v1828_v6  ;;  %v645_v48 = vsel %vm644_vm7, 1, %v1828_v6  ;;  %vm826_vm12 = vcmp.gt.s32.totalorder %v2034_v7, 4  ;;  %s2163_s27 = scalar_lea.hbm %s2250_s5, %s1384_s0  ;;  %s2170_s21 = scalar_lea.hbm %s2249_s4, %s1388_s16 }
  0x4c   : > { %v362_v5 = vpack.c.bf16 %v2009_v3, %v2009_v3  ;;  %vm917_vm14 = vcmp.gt.s32.totalorder %v2034_v7, 5  ;;  %s1150_s12 = sshll.u32 %s335_s26, 4  ;;  %s1119_s15 = scalar_lea.sflag [#allocation10], %s1972_s9  ;;  %s2165_s12 = int_to_ptr.vmem [resolvable:$true] %s1150_s12 }
  0x4d   : > { %s1703_s17 = scalar_lea.vmem %s2165_s12, 32  ;;  %s1830_s24 = smov [#allocation9]  }
  0x4e   : > { %1418 = vmatmul.mubr.msk.bf16.vlgmr.msra.gmra.mxu0 %vm375_vm2, %v362_v5  ;;  %p1704_p8 = scmp.ne.s32.totalorder %s2165_s12, %s1703_s17 }
  0x4f   : > { %1430 = vmatpush3.bf16.msra.mxu0 %v2004_v1  ;;  %1433 = vmatprep.mubr.msk.bf16.mxu0 %vm1826_vm1, %v1825_v0 }
  0x50   : > { %1431 = vmatprep.subr.bf16.mxu0 %v1825_v0  ;;  %p1705_p2 = pnand %p1704_p8, %p1915_p9 }
  0x52   : > { %p1706_p4 = pneg %p1705_p2 }
  0x53   : > { %1432 = vmatpush3.bf16.msra.mxu0 %v2007_v2 }
  0x54   : > { %1445 = vmatprep.subr.bf16.mxu0 %v1825_v0 }
  0xbb   : > { %v2036_v8 = vpop.permute.xlu0 %447 }
 0x10e   : > { %v413_v9 = vpop.f32.mrf.mxu0 }
 0x10f   : > { %432 = vrot.lane.b32.xlu0 %v413_v9, %s1829_s10  ;;  %v450_v10 = vadd.f32 %v2036_v8, %v413_v9  ;;  %v424_v16 = vadd.f32 %v419_v15, %v413_v9 }
 0x110   : > { %v1419_v11 = vpop.f32.mrf.mxu0 }
 0x111   : > { %452 = vrot.lane.b32.xlu1 %v450_v10, %s1827_s28  ;;  %v1328_v17 = vmul.f32 -1.442695, %v424_v16 }
 0x112   : > { %v416_v12 = vpop.f32.mrf.mxu0 }
 0x113   : > { %1567 = vpow2.f32 %v1328_v17 }
 0x114   : > { %v1420_v14 = vpop.f32.mrf.mxu0 }
 0x115   : > { %465 = vperm.xlu1 %1563, %v463_v13  }
 0x120   : > { %v1568_v18 = vpop.eup %1567 }
 0x121   : > { %v428_v19 = vadd.f32 1.0, %v1568_v18 }
 0x123   : > { %1569 = vrcp.f32 %v428_v19 }
 0x130   : > { %v1570_v25 = vpop.eup %1569 }
 0x181   : > { %v433_v21 = vpop.permute.xlu0 %432 }
 0x182   : > { %v435_v22 = vadd.f32 %v1326_v20, %v433_v21 }
 0x183   : > { %v453_v24 = vpop.permute.xlu1 %452 }
 0x184   : > { %v1329_v23 = vmul.f32 -1.442695, %v435_v22  ;;  %v455_v26 = vmul.f32 %v1570_v25, %v453_v24 }
 0x186   : > { %1571 = vpow2.f32 %v1329_v23  ;;  %v456_v30 = vadd.f32 %v1327_v27, %v455_v26  ;;  %v1339_v23 = vld [vmem:[%s1976_s7 + $0x4] sm:$0x3] }
 0x190   : > { %v466_v33 = vpop.permute.xlu1 %465 }
 0x191   : > { %vm467_vm4 = vcmp.eq.s32.totalorder %v466_v33, 1 }
 0x193   : > { %v1572_v28 = vpop.eup %1571 }
 0x194   : > { %v439_v29 = vadd.f32 1.0, %v1572_v28  ;;  %v1340_v28 = vld [vmem:[%s1976_s7 + $0x14] sm:$0x3] }
 0x196   : > { %1573 = vrcp.f32 %v439_v29 }
 0x197   : > { %1575 = vtanh.f32 %v456_v30 }
 0x1a3   : > { %v1574_v31 = vpop.eup %1573 }
 0x1a4   : > { %v458_v32 = vsub.f32 1.0, %v1574_v31  ;;  %v1576_v34 = vpop.eup %1575  ;;  %v460_v35 = vmul.f32 %v1574_v31, %v2009_v3 }
 0x1a6   : > { %v459_v36 = vmul.f32 %v1576_v34, %v458_v32 }
 0x1a8   : > { %v461_v37 = vadd.f32 %v460_v35, %v459_v36  ;;  %v1341_v35 = vld [vmem:[%s1976_s7 + $0x24] sm:$0x3] }
 0x1aa   : > { %v468_v38 = vsel %vm467_vm4, %v461_v37, %v2009_v3  ;;  %v469_v39 = vsel %vm467_vm4, %v461_v37, 0.0  ;;  %vm1099_vm4 = vcmp.gt.s32.totalorder %v2034_v7, 7 }
 0x1ab   : > { %v470_v40 = vpack.c.bf16 %v469_v39, %v469_v39  ;;  %v473_v41 = vpack.c.bf16 %v468_v38, %v468_v38 }
 0x1ad   : > { %472 = vst.msk [vmem:[%s2049_s13] sm:$0x1] %vm471_vm5, %v470_v40  ;;  %1426 = vmatmul.mubr.msk.bf16.vlgmr.msra.gmra.mxu1 %vm375_vm2, %v473_v41 }
 0x1ae   : > { %1438 = vmatpush3.bf16.msra.mxu1 %v2004_v1  ;;  %1441 = vmatprep.mubr.msk.bf16.mxu1 %vm1826_vm1, %v1825_v0 }
 0x1af   : > { %1439 = vmatprep.subr.bf16.mxu1 %v1825_v0 }
 0x1b2   : > { %1440 = vmatpush3.bf16.msra.mxu1 %v2007_v2 }
 0x1b3   : > { %1453 = vmatprep.subr.bf16.mxu1 %v1825_v0 }
 0x26d   : > { %v511_v42 = vpop.f32.mrf.mxu1 }
 0x26e   : > { %v541_v43 = vadd.f32 %v511_v42, %v2036_v8  ;;  %531 = vrot.lane.b32.xlu0 %v511_v42, %s1829_s10  ;;  %v523_v50 = vadd.f32 %v1332_v49, %v511_v42 }
 0x26f   : > { %v1427_v44 = vpop.f32.mrf.mxu1 }
 0x270   : > { %543 = vrot.lane.b32.xlu1 %v541_v43, %s1827_s28  ;;  %v1335_v51 = vmul.f32 -1.442695, %v523_v50 }
 0x271   : > { %v514_v46 = vpop.f32.mrf.mxu1 }
 0x272   : > { %556 = vperm.xlu0 %1564, %v554_v45   ;;  %1577 = vpow2.f32 %v1335_v51 }
 0x273   : > { %v1428_v47 = vpop.f32.mrf.mxu1 }
 0x276   : > { %647 = vperm.xlu0 %1564, %v645_v48  }
 0x27f   : > { %v1578_v52 = vpop.eup %1577 }
 0x280   : > { %v527_v53 = vadd.f32 1.0, %v1578_v52 }
 0x282   : > { %1579 = vrcp.f32 %v527_v53  ;;  %v736_v53 = vsel %vm735_vm10, 1, %v1828_v6 }
 0x28f   : > { %v1580_v59 = vpop.eup %1579 }
 0x2e0   : > { %v532_v55 = vpop.permute.xlu0 %531 }
 0x2e1   : > { %v534_v56 = vadd.f32 %v1333_v54, %v532_v55 }
 0x2e2   : > { %v544_v58 = vpop.permute.xlu1 %543 }
 0x2e3   : > { %v1336_v57 = vmul.f32 -1.442695, %v534_v56  ;;  %v546_v60 = vmul.f32 %v1580_v59, %v544_v58  ;;  %v1346_v56 = vld [vmem:[%s1976_s7 + $0x6] sm:$0x3] }
 0x2e5   : > { %1581 = vpow2.f32 %v1336_v57  ;;  %v547_v3 = vadd.f32 %v1334_v61, %v546_v60  ;;  %v1347_v61 = vld [vmem:[%s1976_s7 + $0x16] sm:$0x3] }
 0x2ed   : > { %v557_v11 = vpop.permute.xlu0 %556 }
 0x2ee   : > { %vm558_vm8 = vcmp.eq.s32.totalorder %v557_v11, 1 }
 0x2f1   : > { %v648_v42 = vpop.permute.xlu0 %647 }
 0x2f2   : > { %v1582_v62 = vpop.eup %1581  ;;  %vm649_vm9 = vcmp.eq.s32.totalorder %v648_v42, 1 }
 0x2f3   : > { %v538_v63 = vadd.f32 1.0, %v1582_v62 }
 0x2f5   : > { %1583 = vrcp.f32 %v538_v63 }
 0x2f6   : > { %1585 = vtanh.f32 %v547_v3 }
 0x302   : > { %v1584_v4 = vpop.eup %1583 }
 0x303   : > { %v549_v5 = vsub.f32 1.0, %v1584_v4  ;;  %v1586_v9 = vpop.eup %1585  ;;  %v551_v10 = vmul.f32 %v1584_v4, %v468_v38 }
 0x305   : > { %v550_v12 = vmul.f32 %v1586_v9, %v549_v5 }
 0x307   : > { %v552_v13 = vadd.f32 %v551_v10, %v550_v12  ;;  %v1348_v10 = vld [vmem:[%s1976_s7 + $0x26] sm:$0x3] }
 0x309   : > { %v559_v14 = vsel %vm558_vm8, %v552_v13, %v468_v38  ;;  %v560_v15 = vsel %vm558_vm8, %v552_v13, 0.0 }
 0x30a   : > { %v561_v16 = vpack.c.bf16 %v560_v15, %v560_v15  ;;  %v564_v17 = vpack.c.bf16 %v559_v14, %v559_v14 }
 0x30c   : > { %1337 = vst.msk [vmem:[%s2049_s13 + $0x1] sm:$0x1] %vm471_vm5, %v561_v16  ;;  %1434 = vmatmul.mubr.msk.bf16.vlgmr.msra.gmra.mxu0 %vm375_vm2, %v564_v17 }
 0x30d   : > { %1446 = vmatpush3.bf16.msra.mxu0 %v2004_v1  ;;  %1449 = vmatprep.mubr.msk.bf16.mxu0 %vm1826_vm1, %v1825_v0 }
 0x30e   : > { %1447 = vmatprep.subr.bf16.mxu0 %v1825_v0 }
 0x311   : > { %1448 = vmatpush3.bf16.msra.mxu0 %v2007_v2 }
 0x312   : > { %1461 = vmatprep.subr.bf16.mxu0 %v1825_v0 }
 0x3cc   : > { %v602_v18 = vpop.f32.mrf.mxu0 }
 0x3cd   : > { %622 = vrot.lane.b32.xlu1 %v602_v18, %s1829_s10  ;;  %v632_v20 = vadd.f32 %v602_v18, %v2036_v8  ;;  %v614_v24 = vadd.f32 %v1339_v23, %v602_v18 }
 0x3ce   : > { %v1435_v19 = vpop.f32.mrf.mxu0 }
 0x3cf   : > { %v1342_v25 = vmul.f32 -1.442695, %v614_v24 }
 0x3d0   : > { %v605_v21 = vpop.f32.mrf.mxu0 }
 0x3d1   : > { %634 = vrot.lane.b32.xlu1 %v632_v20, %s1827_s28  ;;  %1587 = vpow2.f32 %v1342_v25 }
 0x3d2   : > { %v1436_v22 = vpop.f32.mrf.mxu0 }
 0x3de   : > { %v1588_v26 = vpop.eup %1587 }
 0x3df   : > { %v618_v27 = vadd.f32 1.0, %v1588_v26 }
 0x3e1   : > { %1589 = vrcp.f32 %v618_v27 }
 0x3ee   : > { %v1590_v33 = vpop.eup %1589 }
 0x43f   : > { %v623_v29 = vpop.permute.xlu1 %622 }
 0x440   : > { %v625_v30 = vadd.f32 %v1340_v28, %v623_v29  ;;  %v827_v28 = vsel %vm826_vm12, 1, %v1828_v6 }
 0x442   : > { %v1343_v31 = vmul.f32 -1.442695, %v625_v30 }
 0x443   : > { %v635_v32 = vpop.permute.xlu1 %634 }
 0x444   : > { %1591 = vpow2.f32 %v1343_v31  ;;  %v637_v34 = vmul.f32 %v1590_v33, %v635_v32  ;;  %v1353_v31 = vld [vmem:[%s1976_s7 + $0x8] sm:$0x3] }
 0x446   : > { %v638_v38 = vadd.f32 %v1341_v35, %v637_v34 }
 0x451   : > { %v1592_v36 = vpop.eup %1591 }
 0x452   : > { %v629_v37 = vadd.f32 1.0, %v1592_v36  ;;  %v1354_v36 = vld [vmem:[%s1976_s7 + $0x18] sm:$0x3] }
 0x454   : > { %1593 = vrcp.f32 %v629_v37 }
 0x455   : > { %1595 = vtanh.f32 %v638_v38 }
 0x461   : > { %v1594_v39 = vpop.eup %1593 }
 0x462   : > { %v640_v40 = vsub.f32 1.0, %v1594_v39  ;;  %v1596_v41 = vpop.eup %1595  ;;  %v642_v43 = vmul.f32 %v1594_v39, %v559_v14 }
 0x464   : > { %v641_v44 = vmul.f32 %v1596_v41, %v640_v40 }
 0x466   : > { %v643_v45 = vadd.f32 %v642_v43, %v641_v44  ;;  %v1355_v43 = vld [vmem:[%s1976_s7 + $0x28] sm:$0x3] }
 0x468   : > { %v650_v46 = vsel %vm649_vm9, %v643_v45, %v559_v14  ;;  %v651_v47 = vsel %vm649_vm9, %v643_v45, 0.0 }
 0x469   : > { %v652_v48 = vpack.c.bf16 %v651_v47, %v651_v47  ;;  %v655_v49 = vpack.c.bf16 %v650_v46, %v650_v46 }
 0x46b   : > { %1344 = vst.msk [vmem:[%s2049_s13 + $0x2] sm:$0x1] %vm471_vm5, %v652_v48  ;;  %1442 = vmatmul.mubr.msk.bf16.vlgmr.msra.gmra.mxu1 %vm375_vm2, %v655_v49 }
 0x46c   : > { %1454 = vmatpush3.bf16.msra.mxu1 %v2004_v1  ;;  %1457 = vmatprep.mubr.msk.bf16.mxu1 %vm1826_vm1, %v1825_v0 }
 0x46d   : > { %1455 = vmatprep.subr.bf16.mxu1 %v1825_v0 }
 0x470   : > { %1456 = vmatpush3.bf16.msra.mxu1 %v2007_v2 }
 0x471   : > { %1469 = vmatprep.subr.bf16.mxu1 %v1825_v0 }
 0x52b   : > { %v693_v50 = vpop.f32.mrf.mxu1 }
 0x52c   : > { %v723_v51 = vadd.f32 %v693_v50, %v2036_v8  ;;  %713 = vrot.lane.b32.xlu1 %v693_v50, %s1829_s10  ;;  %v705_v57 = vadd.f32 %v1346_v56, %v693_v50 }
 0x52d   : > { %v1443_v52 = vpop.f32.mrf.mxu1 }
 0x52e   : > { %725 = vrot.lane.b32.xlu0 %v723_v51, %s1827_s28  ;;  %v1349_v58 = vmul.f32 -1.442695, %v705_v57 }
 0x52f   : > { %v696_v54 = vpop.f32.mrf.mxu1 }
 0x530   : > { %738 = vperm.xlu1 %1563, %v736_v53   ;;  %1597 = vpow2.f32 %v1349_v58 }
 0x531   : > { %v1444_v55 = vpop.f32.mrf.mxu1 }
 0x53d   : > { %v1598_v59 = vpop.eup %1597 }
 0x53e   : > { %v709_v60 = vadd.f32 1.0, %v1598_v59 }
 0x540   : > { %1599 = vrcp.f32 %v709_v60 }
 0x54d   : > { %v1600_v5 = vpop.eup %1599 }
 0x59e   : > { %v714_v62 = vpop.permute.xlu1 %713 }
 0x59f   : > { %v716_v63 = vadd.f32 %v1347_v61, %v714_v62  ;;  %v918_v61 = vsel %vm917_vm14, 1, %v1828_v6 }
 0x5a0   : > { %v726_v4 = vpop.permute.xlu0 %725 }
 0x5a1   : > { %v1350_v3 = vmul.f32 -1.442695, %v716_v63  ;;  %v728_v9 = vmul.f32 %v1600_v5, %v726_v4  ;;  %v1361_v5 = vld [vmem:[%s1976_s7 + $0x1a] sm:$0x3] }
 0x5a3   : > { %1601 = vpow2.f32 %v1350_v3  ;;  %v729_v13 = vadd.f32 %v1348_v10, %v728_v9 }
 0x5ab   : > { %v739_v18 = vpop.permute.xlu1 %738 }
 0x5ac   : > { %vm740_vm11 = vcmp.eq.s32.totalorder %v739_v18, 1 }
 0x5b0   : > { %v1602_v11 = vpop.eup %1601 }
 0x5b1   : > { %v720_v12 = vadd.f32 1.0, %v1602_v11 }
 0x5b3   : > { %1603 = vrcp.f32 %v720_v12 }
 0x5b4   : > { %1605 = vtanh.f32 %v729_v13 }
 0x5c0   : > { %v1604_v14 = vpop.eup %1603 }
 0x5c1   : > { %v731_v15 = vsub.f32 1.0, %v1604_v14  ;;  %v1606_v16 = vpop.eup %1605  ;;  %v733_v17 = vmul.f32 %v1604_v14, %v650_v46 }
 0x5c3   : > { %v732_v19 = vmul.f32 %v1606_v16, %v731_v15  ;;  %v1362_v15 = vld [vmem:[%s1976_s7 + $0x2a] sm:$0x3] }
 0x5c5   : > { %v734_v20 = vadd.f32 %v733_v17, %v732_v19 }
 0x5c7   : > { %v741_v21 = vsel %vm740_vm11, %v734_v20, %v650_v46  ;;  %v742_v22 = vsel %vm740_vm11, %v734_v20, 0.0 }
 0x5c8   : > { %v743_v23 = vpack.c.bf16 %v742_v22, %v742_v22  ;;  %v746_v24 = vpack.c.bf16 %v741_v21, %v741_v21 }
 0x5ca   : > { %1351 = vst.msk [vmem:[%s2049_s13 + $0x3] sm:$0x1] %vm471_vm5, %v743_v23  ;;  %1450 = vmatmul.mubr.msk.bf16.vlgmr.msra.gmra.mxu0 %vm375_vm2, %v746_v24 }
 0x5cb   : > { %1462 = vmatpush3.bf16.msra.mxu0 %v2004_v1  ;;  %1465 = vmatprep.mubr.msk.bf16.mxu0 %vm1826_vm1, %v1825_v0 }
 0x5cc   : > { %1463 = vmatprep.subr.bf16.mxu0 %v1825_v0 }
 0x5cf   : > { %1464 = vmatpush3.bf16.msra.mxu0 %v2007_v2 }
 0x68a   : > { %v784_v25 = vpop.f32.mrf.mxu0 }
 0x68b   : > { %v814_v26 = vadd.f32 %v784_v25, %v2036_v8  ;;  %804 = vrot.lane.b32.xlu0 %v784_v25, %s1829_s10  ;;  %v796_v32 = vadd.f32 %v1353_v31, %v784_v25 }
 0x68c   : > { %v1451_v27 = vpop.f32.mrf.mxu0 }
 0x68d   : > { %816 = vrot.lane.b32.xlu1 %v814_v26, %s1827_s28  ;;  %v1356_v33 = vmul.f32 -1.442695, %v796_v32 }
 0x68e   : > { %v787_v29 = vpop.f32.mrf.mxu0 }
 0x68f   : > { %829 = vperm.xlu0 %1564, %v827_v28   ;;  %1607 = vpow2.f32 %v1356_v33 }
 0x690   : > { %v1452_v30 = vpop.f32.mrf.mxu0 }
 0x69c   : > { %v1608_v34 = vpop.eup %1607 }
 0x69d   : > { %v800_v35 = vadd.f32 1.0, %v1608_v34 }
 0x69f   : > { %1609 = vrcp.f32 %v800_v35 }
 0x6ac   : > { %v1610_v41 = vpop.eup %1609 }
 0x6fd   : > { %v805_v37 = vpop.permute.xlu0 %804 }
 0x6fe   : > { %v807_v38 = vadd.f32 %v1354_v36, %v805_v37  ;;  %v1367_v36 = vld [vmem:[%s1976_s7 + $0xc] sm:$0x3] }
 0x6ff   : > { %v817_v40 = vpop.permute.xlu1 %816 }
 0x700   : > { %v1357_v39 = vmul.f32 -1.442695, %v807_v38  ;;  %v819_v42 = vmul.f32 %v1610_v41, %v817_v40  ;;  %v1368_v41 = vld [vmem:[%s1976_s7 + $0x1c] sm:$0x3] }
 0x702   : > { %1611 = vpow2.f32 %v1357_v39  ;;  %v820_v46 = vadd.f32 %v1355_v43, %v819_v42 }
 0x70a   : > { %v830_v51 = vpop.permute.xlu0 %829 }
 0x70b   : > { %vm831_vm13 = vcmp.eq.s32.totalorder %v830_v51, 1 }
 0x70f   : > { %v1612_v44 = vpop.eup %1611 }
 0x710   : > { %v811_v45 = vadd.f32 1.0, %v1612_v44 }
 0x712   : > { %1613 = vrcp.f32 %v811_v45 }
 0x713   : > { %1615 = vtanh.f32 %v820_v46 }
 0x71f   : > { %v1614_v47 = vpop.eup %1613 }
 0x720   : > { %v822_v48 = vsub.f32 1.0, %v1614_v47  ;;  %v1616_v49 = vpop.eup %1615  ;;  %v824_v50 = vmul.f32 %v1614_v47, %v741_v21 }
 0x722   : > { %v823_v52 = vmul.f32 %v1616_v49, %v822_v48  ;;  %v1369_v48 = vld [vmem:[%s1976_s7 + $0x2c] sm:$0x3] }
 0x724   : > { %v825_v53 = vadd.f32 %v824_v50, %v823_v52 }
 0x726   : > { %v832_v54 = vsel %vm831_vm13, %v825_v53, %v741_v21  ;;  %v833_v55 = vsel %vm831_vm13, %v825_v53, 0.0 }
 0x727   : > { %v834_v56 = vpack.c.bf16 %v833_v55, %v833_v55  ;;  %v837_v57 = vpack.c.bf16 %v832_v54, %v832_v54 }
 0x729   : > { %1358 = vst.msk [vmem:[%s2049_s13 + $0x4] sm:$0x1] %vm471_vm5, %v834_v56  ;;  %1458 = vmatmul.mubr.msk.bf16.vlgmr.msra.gmra.mxu1 %vm375_vm2, %v837_v57 }
 0x72a   : > { %1470 = vmatpush3.bf16.msra.mxu1 %v2004_v1  ;;  %1473 = vmatprep.mubr.msk.bf16.mxu1 %vm1826_vm1, %v1825_v0  ;;  %vm1008_vm1 = vcmp.gt.s32.totalorder %v2034_v7, 6 }
 0x72b   : > { %1471 = vmatprep.subr.bf16.mxu1 %v1825_v0  ;;  %v1360_v0 = vld [vmem:[%s1976_s7 + $0xa] sm:$0x3]  ;;  %v1009_v33 = vsel %vm1008_vm1, 1, %v1828_v6 }
 0x72e   : > { %1472 = vmatpush3.bf16.msra.mxu1 %v2007_v2 }
 0x7e9   : > { %v875_v58 = vpop.f32.mrf.mxu1 }
 0x7ea   : > { %v905_v59 = vadd.f32 %v875_v58, %v2036_v8  ;;  %895 = vrot.lane.b32.xlu1 %v875_v58, %s1829_s10  ;;  %v887_v63 = vadd.f32 %v1360_v0, %v875_v58 }
 0x7eb   : > { %v1459_v60 = vpop.f32.mrf.mxu1 }
 0x7ec   : > { %907 = vrot.lane.b32.xlu0 %v905_v59, %s1827_s28  ;;  %v1363_v2 = vmul.f32 -1.442695, %v887_v63 }
 0x7ed   : > { %v878_v1 = vpop.f32.mrf.mxu1 }
 0x7ee   : > { %920 = vperm.xlu1 %1563, %v918_v61   ;;  %1617 = vpow2.f32 %v1363_v2  ;;  %v1100_v2 = vsel %vm1099_vm4, 1, %v1828_v6 }
 0x7ef   : > { %v1460_v62 = vpop.f32.mrf.mxu1 }
 0x7fb   : > { %v1618_v3 = vpop.eup %1617 }
 0x7fc   : > { %v891_v4 = vadd.f32 1.0, %v1618_v3 }
 0x7fe   : > { %1619 = vrcp.f32 %v891_v4 }
 0x80b   : > { %v1620_v13 = vpop.eup %1619 }
 0x85c   : > { %v896_v9 = vpop.permute.xlu1 %895 }
 0x85d   : > { %v898_v10 = vadd.f32 %v1361_v5, %v896_v9  ;;  %v1374_v5 = vld [vmem:[%s1976_s7 + $0xe] sm:$0x3] }
 0x85e   : > { %v908_v12 = vpop.permute.xlu0 %907 }
 0x85f   : > { %v1364_v11 = vmul.f32 -1.442695, %v898_v10  ;;  %v910_v14 = vmul.f32 %v1620_v13, %v908_v12  ;;  %v1375_v12 = vld [vmem:[%s1976_s7 + $0x1e] sm:$0x3] }
 0x861   : > { %1621 = vpow2.f32 %v1364_v11  ;;  %v911_v18 = vadd.f32 %v1362_v15, %v910_v14 }
 0x869   : > { %v921_v23 = vpop.permute.xlu1 %920 }
 0x86a   : > { %vm922_vm15 = vcmp.eq.s32.totalorder %v921_v23, 1 }
 0x86e   : > { %v1622_v16 = vpop.eup %1621 }
 0x86f   : > { %v902_v17 = vadd.f32 1.0, %v1622_v16 }
 0x871   : > { %1623 = vrcp.f32 %v902_v17  ;;  %v1376_v17 = vld [vmem:[%s1976_s7 + $0x2e] sm:$0x3]  ;;  %s1134_s7 = sshll.u32 %s2049_s13, 4  ;;  %s2172_s7 = int_to_ptr.vmem [resolvable:$true] %s1134_s7 }
 0x872   : > { %1625 = vtanh.f32 %v911_v18 }
 0x87e   : > { %v1624_v19 = vpop.eup %1623 }
 0x87f   : > { %v913_v20 = vsub.f32 1.0, %v1624_v19  ;;  %v1626_v21 = vpop.eup %1625  ;;  %v915_v22 = vmul.f32 %v1624_v19, %v832_v54 }
 0x881   : > { %v914_v24 = vmul.f32 %v1626_v21, %v913_v20 }
 0x883   : > { %v916_v25 = vadd.f32 %v915_v22, %v914_v24 }
 0x885   : > { %v923_v26 = vsel %vm922_vm15, %v916_v25, %v832_v54  ;;  %v924_v27 = vsel %vm922_vm15, %v916_v25, 0.0 }
 0x886   : > { %v925_v28 = vpack.c.bf16 %v924_v27, %v924_v27  ;;  %v928_v29 = vpack.c.bf16 %v923_v26, %v923_v26 }
 0x888   : > { %1365 = vst.msk [vmem:[%s2049_s13 + $0x5] sm:$0x1] %vm471_vm5, %v925_v28  ;;  %1466 = vmatmul.mubr.msk.bf16.vlgmr.msra.gmra.mxu0 %vm375_vm2, %v928_v29 }
 0x948   : > { %v966_v30 = vpop.f32.mrf.mxu0 }
 0x949   : > { %v996_v31 = vadd.f32 %v966_v30, %v2036_v8  ;;  %986 = vrot.lane.b32.xlu0 %v966_v30, %s1829_s10  ;;  %v978_v37 = vadd.f32 %v1367_v36, %v966_v30 }
 0x94a   : > { %v1467_v32 = vpop.f32.mrf.mxu0 }
 0x94b   : > { %998 = vrot.lane.b32.xlu1 %v996_v31, %s1827_s28  ;;  %v1370_v38 = vmul.f32 -1.442695, %v978_v37 }
 0x94c   : > { %v969_v34 = vpop.f32.mrf.mxu0 }
 0x94d   : > { %1011 = vperm.xlu0 %1564, %v1009_v33   ;;  %1627 = vpow2.f32 %v1370_v38 }
 0x94e   : > { %v1468_v35 = vpop.f32.mrf.mxu0 }
 0x95a   : > { %v1628_v39 = vpop.eup %1627 }
 0x95b   : > { %v982_v40 = vadd.f32 1.0, %v1628_v39 }
 0x95d   : > { %1629 = vrcp.f32 %v982_v40 }
 0x96a   : > { %v1630_v46 = vpop.eup %1629 }
 0x9bb   : > { %v987_v42 = vpop.permute.xlu0 %986 }
 0x9bc   : > { %v989_v43 = vadd.f32 %v1368_v41, %v987_v42 }
 0x9bd   : > { %v999_v45 = vpop.permute.xlu1 %998 }
 0x9be   : > { %v1371_v44 = vmul.f32 -1.442695, %v989_v43  ;;  %v1001_v47 = vmul.f32 %v1630_v46, %v999_v45 }
 0x9c0   : > { %1631 = vpow2.f32 %v1371_v44  ;;  %v1002_v51 = vadd.f32 %v1369_v48, %v1001_v47 }
 0x9c8   : > { %v1012_v56 = vpop.permute.xlu0 %1011 }
 0x9c9   : > { %vm1013_vm3 = vcmp.eq.s32.totalorder %v1012_v56, 1 }
 0x9cd   : > { %v1632_v49 = vpop.eup %1631 }
 0x9ce   : > { %v993_v50 = vadd.f32 1.0, %v1632_v49 }
 0x9d0   : > { %1633 = vrcp.f32 %v993_v50 }
 0x9d1   : > { %1635 = vtanh.f32 %v1002_v51 }
 0x9dd   : > { %v1634_v52 = vpop.eup %1633 }
 0x9de   : > { %v1004_v53 = vsub.f32 1.0, %v1634_v52  ;;  %v1636_v54 = vpop.eup %1635  ;;  %v1006_v55 = vmul.f32 %v1634_v52, %v923_v26 }
 0x9e0   : > { %v1005_v57 = vmul.f32 %v1636_v54, %v1004_v53 }
 0x9e2   : > { %v1007_v58 = vadd.f32 %v1006_v55, %v1005_v57 }
 0x9e4   : > { %v1014_v59 = vsel %vm1013_vm3, %v1007_v58, %v923_v26  ;;  %v1015_v60 = vsel %vm1013_vm3, %v1007_v58, 0.0 }
 0x9e5   : > { %v1016_v61 = vpack.c.bf16 %v1015_v60, %v1015_v60  ;;  %v1019_v1 = vpack.c.bf16 %v1014_v59, %v1014_v59 }
 0x9e7   : > { %1372 = vst.msk [vmem:[%s2049_s13 + $0x6] sm:$0x1] %vm471_vm5, %v1016_v61  ;;  %1474 = vmatmul.mubr.msk.bf16.vlgmr.msra.gmra.mxu1 %vm375_vm2, %v1019_v1 }
 0xaa7   : > { %v1057_v62 = vpop.f32.mrf.mxu1 }
 0xaa8   : > { %v1087_v0 = vadd.f32 %v1057_v62, %v2036_v8  ;;  %1077 = vrot.lane.b32.xlu1 %v1057_v62, %s1829_s10  ;;  %v1069_v9 = vadd.f32 %v1374_v5, %v1057_v62  ;;  %s1707_s10 = sshll.u32 %s1830_s24, 4  ;;  %s1708_s10 = int_to_ptr.vmem [resolvable:$false] %s1707_s10 }
 0xaa9   : > { %v1475_v63 = vpop.f32.mrf.mxu1  ;;  %s1709_s11 = scalar_lea.vmem %s1708_s10, 64  ;;  %p1710_p5 = scmp.lt.s32.totalorder %s2165_s12, %s1708_s10 }
 0xaaa   : > { %1089 = vrot.lane.b32.xlu0 %v1087_v0, %s1827_s28  ;;  %v1377_v10 = vmul.f32 -1.442695, %v1069_v9  ;;  %p1711_p6 = scmp.lt.s32.totalorder %s1709_s11, %s1703_s17 }
 0xaab   : > { %v1060_v3 = vpop.f32.mrf.mxu1 }
 0xaac   : > { %1102 = vperm.xlu1 %1563, %v1100_v2   ;;  %1637 = vpow2.f32 %v1377_v10  ;;  %p1712_p7 = por %p1711_p6, %p1710_p5 }
 0xaad   : > { %v1476_v4 = vpop.f32.mrf.mxu1 }
 0xaae   : > { %p1713_p1 = pnand %p1712_p7, %p1706_p4 }
 0xab9   : > { %v1638_v7 = vpop.eup %1637 }
 0xaba   : > { %v1073_v11 = vadd.f32 1.0, %v1638_v7 }
 0xabc   : > { %1639 = vrcp.f32 %v1073_v11 }
 0xac9   : > { %v1640_v15 = vpop.eup %1639 }
 0xb1a   : > { %v1078_v8 = vpop.permute.xlu1 %1077 }
 0xb1b   : > { %v1080_v13 = vadd.f32 %v1375_v12, %v1078_v8 }
 0xb1c   : > { %v1090_v6 = vpop.permute.xlu0 %1089 }
 0xb1d   : > { %v1378_v14 = vmul.f32 -1.442695, %v1080_v13  ;;  %v1092_v16 = vmul.f32 %v1640_v15, %v1090_v6 }
 0xb1f   : > { %1641 = vpow2.f32 %v1378_v14  ;;  %v1093_v20 = vadd.f32 %v1376_v17, %v1092_v16 }
 0xb27   : > { %v1103_v25 = vpop.permute.xlu1 %1102 }
 0xb28   : > { %vm1104_vm2 = vcmp.eq.s32.totalorder %v1103_v25, 1 }
 0xb2c   : > { %v1642_v18 = vpop.eup %1641 }
 0xb2d   : > { %v1084_v19 = vadd.f32 1.0, %v1642_v18 }
 0xb2f   : > { %1643 = vrcp.f32 %v1084_v19 }
 0xb30   : > { %1645 = vtanh.f32 %v1093_v20 }
 0xb3c   : > { %v1644_v21 = vpop.eup %1643 }
 0xb3d   : > { %v1095_v22 = vsub.f32 1.0, %v1644_v21  ;;  %v1646_v23 = vpop.eup %1645  ;;  %v1097_v24 = vmul.f32 %v1644_v21, %v1014_v59 }
 0xb3f   : > { %v1096_v26 = vmul.f32 %v1646_v23, %v1095_v22 }
 0xb41   : > { %v1098_v27 = vadd.f32 %v1097_v24, %v1096_v26 }
 0xb43   : > { %v1105_v28 = vsel %vm1104_vm2, %v1098_v27, %v1014_v59  ;;  %v1106_v29 = vsel %vm1104_vm2, %v1098_v27, 0.0 }
 0xb44   : > { %v1107_v30 = vpack.c.bf16 %v1106_v29, %v1106_v29  ;;  %1111 = vst.msk [vmem:[#allocation2] sm:$0x3] %vm350_vm0, %v1105_v28  ;;  %1112 = vst.msk [vmem:[%s335_s26] sm:$0x3] %vm350_vm0, %v1105_v28 }
 0xb45   : > { %1716 = shalt.err (!%p1713_p1)
}
 0xb46   : > { %s1717_s14 = scalar_lea.hbm %s2163_s27, 32  ;;  %s1721_s16 = scalar_lea.hbm %s2250_s5, 64 }
 0xb47   : > { %p1718_p10 = scmp.ne.s32.totalorder %s2163_s27, %s1717_s14  ;;  %p1722_p0 = scmp.lt.s32.totalorder %s2163_s27, %s2250_s5 }
 0xb48   : > { %p1723_p8 = scmp.lt.s32.totalorder %s1721_s16, %s1717_s14 }
 0xb49   : > { %p1719_p13 = pnand %p1718_p10, %p1915_p9 }
 0xb4a   : > { %p1724_p2 = por %p1723_p8, %p1722_p0 }
 0xb4b   : > { %p1720_p3 = pneg %p1719_p13 }
 0xb4d   : > { %p1725_p4 = pnand %p1724_p2, %p1720_p3 }
 0xb4f   : > { %1728 = shalt.err (!%p1725_p4)
}
 0xb50   : > { %1485 = dma.vmem_to_hbm [thread:$0]  (%p1915_p9), %s2165_s12, 32, %s2163_s27, %s1119_s15   ;;  %1379 = vst.msk [vmem:[%s2049_s13 + $0x7] sm:$0x1] %vm471_vm5, %v1107_v30 }
 0xb51   : > { %s1114_s28 = scalar_lea.sflag [#allocation5], %s1972_s9  ;;  %s1729_s29 = scalar_lea.vmem %s2172_s7, 128 }
 0xb52   : > { %p1730_p5 = scmp.ne.s32.totalorder %s2172_s7, %s1729_s29  ;;  %s1831_s17 = smov [#allocation8]  }
 0xb53   : > { %s1733_s24 = sshll.u32 %s1831_s17, 4  ;;  %s1734_s24 = int_to_ptr.vmem [resolvable:$false] %s1733_s24 }
 0xb54   : > { %p1731_p6 = pnand %p1730_p5, %p1915_p9  ;;  %s1735_s10 = scalar_lea.vmem %s1734_s24, 256 }
 0xb55   : > { %p1736_p1 = scmp.lt.s32.totalorder %s2172_s7, %s1734_s24  ;;  %p1737_p10 = scmp.lt.s32.totalorder %s1735_s10, %s1729_s29 }
 0xb56   : > { %p1732_p7 = pneg %p1731_p6 }
 0xb57   : > { %p1738_p13 = por %p1737_p10, %p1736_p1 }
 0xb59   : > { %p1739_p3 = pnand %p1738_p13, %p1732_p7 }
 0xb5b   : > { %1742 = shalt.err (!%p1739_p3)
}
 0xb5c   : > { %s1743_s13 = scalar_lea.hbm %s2170_s21, 128  ;;  %s1747_s15 = scalar_lea.hbm %s2249_s4, 256 }
 0xb5d   : > { %p1744_p0 = scmp.ne.s32.totalorder %s2170_s21, %s1743_s13  ;;  %p1748_p4 = scmp.lt.s32.totalorder %s2170_s21, %s2249_s4 }
 0xb5e   : > { %p1749_p5 = scmp.lt.s32.totalorder %s1747_s15, %s1743_s13 }
 0xb5f   : > { %p1745_p8 = pnand %p1744_p0, %p1915_p9 }
 0xb60   : > { %p1750_p6 = por %p1749_p5, %p1748_p4 }
 0xb61   : > { %p1746_p2 = pneg %p1745_p8 }
 0xb63   : > { %p1751_p7 = pnand %p1750_p6, %p1746_p2 }
 0xb65   : > { %1754 = shalt.err (!%p1751_p7)
}
 0xb66   : > { %s1832_s0 = smov 16   ;;  %s1833_s26 = smov 1  }
 0xb67   : > { %1484 = dma.vmem_to_hbm [thread:$0]  (%p1915_p9), %s2172_s7, 128, %s2170_s21, %s1114_s28, %s1832_s0, %s1832_s0, %s1833_s26  }
 0xb68 PF: > { %s1162_s16 = sand.u32 1, %s1797_s18   ;;  %p1496_p1 = pnand %p1313_p12, %p1922_p11 }
 0xb69   : > { %s1163_s30 = scalar_lea.sflag [#allocation5], %s1162_s16 }
 0xb6a   : > { %p1497_p10 = pneg %p1496_p1 }
 0xb6c   : > { %1788 = dma.done.wait (%p1497_p10), %s1163_s30, 128  }
 0xb6d   : > { %1790 = vsyncadd (%p1497_p10), %s1163_s30, 4294967168  ;;  %s1172_s25 = scalar_lea.sflag [#allocation10], %s1162_s16 }
 0xb6e   : > { %1792 = dma.done.wait (%p1497_p10), %s1172_s25, 32  }
 0xb6f   : > { %1794 = vsyncadd (%p1497_p10), %s1172_s25, 4294967264  ;;  %s28_s23 = sadd.s32 1, %s1817_s23   ;;  %s2262_s6 = sld [smem:[#allocation16_spill]] }
 0xb70   : > { %p25_p13 = scmp.ge.s32.totalorder %s28_s23, 4   ;;  %s2263_s9 = sld [smem:[#allocation15_spill]] }
 0xb71   : > { %s2264_s18 = smov %s1801_s19  ;;  %s2265_s19 = smov %s1805_s20 }
 0xb72   : > { %s2267_s21 = smov %s1813_s22  ;;  %27 = sbr.rel (!%p25_p13) target bundleno = 12 (0xc), region = 151 }
 0xb75   : > { %s2266_s20 = smov %s2262_s6 }
 0xb76   : > { %s2268_s22 = smov %s2263_s9 }
 0xb77   :  { %1177 = vsyncpa [#allocation4], 1 }
 0xb78   :  { %1179 = vsyncpa [#allocation4 + $0x1], 1 }
 0xb79   :  { %1180 = vsyncpa [#allocation7], 1 }
 0xb7a   :  { %1182 = vsyncpa [#allocation7 + $0x1], 1 }
 0xb7b   :  { %1183 = vsyncpa [#allocation5], 1 }
 0xb7c   :  { %1185 = vsyncpa [#allocation5 + $0x1], 1 }
 0xb7d   :  { %1186 = vsyncpa [#allocation10], 1 }
 0xb7e   :  { %1188 = vsyncpa [#allocation10 + $0x1], 1 }

</bundles_post_ra>
